<compile_context>
chip_gen: v6e
topology: v6e:2x2x1
jax: 0.10.0
libtpu: 0.0.40
codegen_flags: <defaults>
</compile_context>

<pallas_src>
import functools
import math

import jax
import jax.numpy as jnp
from jax.experimental import pallas as pl
from jax.experimental.pallas import tpu as pltpu

# ---------------- model config (small, consistent with the module) ----------------
B = 2            # batch
S = 8            # sequence length
H = 32           # hidden size (MiniLM hidden_size stand-in)
NH = 2           # attention heads
HD = H // NH     # head dim
FF = 64          # feed-forward dim
L = 2            # number of transformer layers (12 in real MiniLM)
E = 16           # embedding_dim of TextEncoder
VOCAB = 64
MAX_POS = 16
LN_EPS = 1e-12


def _layernorm(x, g, b):
    mu = jnp.mean(x, axis=-1, keepdims=True)
    var = jnp.mean((x - mu) ** 2, axis=-1, keepdims=True)
    return (x - mu) * jax.lax.rsqrt(var + LN_EPS) * g + b


# ---------------- fused Pallas kernel: gather -> embeddings -> L layers -> pool -> fc_embed ----------------
def encoder_kernel(ids_ref,                                   # (B*S,) int32, scalar-prefetched (SMEM)
                   mask_ref, pemb_ref, embln_ref, fc_ref,
                   wqkv_ref, bqkv_ref, wo_ref, vecs_ref,
                   w1_ref, b1_ref, w2_ref, wemb_hbm,
                   o_ref,
                   tok_buf, dma_sem,
                   *, num_layers, num_heads, head_dim, seq, hidden):
    b = pl.program_id(0)
    scale = 1.0 / math.sqrt(head_dim)
    bf16 = jnp.bfloat16

    # ---- token-embedding gather: S small row DMAs from the HBM table, all overlapped ----
    for s in range(seq):                                       # static loop, S is small
        tid = ids_ref[b * seq + s]
        pltpu.make_async_copy(wemb_hbm.at[pl.ds(tid, 1), :],
                              tok_buf.at[pl.ds(s, 1), :],
                              dma_sem.at[s]).start()
    for s in range(seq):
        pltpu.make_async_copy(wemb_hbm.at[pl.ds(0, 1), :],     # same transfer shape -> same byte count
                              tok_buf.at[pl.ds(s, 1), :],
                              dma_sem.at[s]).wait()

    # ---- embeddings + embedding LayerNorm (f32) ----
    x = _layernorm(tok_buf[...] + pemb_ref[...],
                   embln_ref[0:1, :], embln_ref[1:2, :])       # (S, H) f32

    # ---- key-padding additive bias, broadcasts over the query axis of the (S, S) scores ----
    kmask = mask_ref[...].reshape(1, seq)                      # (1, S) f32
    bias = jnp.where(kmask > 0.5, 0.0, -1e9).astype(jnp.float32)

    def layer(l, x):
        wqkv = wqkv_ref[l]                                     # (H, 3H) bf16
        bqkv = bqkv_ref[l]                                     # (1, 3H) f32
        wo = wo_ref[l]                                         # (H, H)  bf16
        vec = vecs_ref[l]                                      # (6, H): bo, ln1_g, ln1_b, b2, ln2_g, ln2_b
        bo, ln1_g, ln1_b = vec[0:1], vec[1:2], vec[2:3]
        b2, ln2_g, ln2_b = vec[3:4], vec[4:5], vec[5:6]

        # One fused QKV matmul + fused bias add (bf16 operands, f32 accumulate).
        qkv = jnp.dot(x.astype(bf16), wqkv,
                      preferred_element_type=jnp.float32) + bqkv   # (S, 3H) f32

        ctx = []
        for h in range(num_heads):                              # static head loop, lane slices only
            q_h = qkv[:, h * head_dim:(h + 1) * head_dim]
            k_h = qkv[:, hidden + h * head_dim: hidden + (h + 1) * head_dim]
            v_h = qkv[:, 2 * hidden + h * head_dim: 2 * hidden + (h + 1) * head_dim]
            s_h = jax.lax.dot_general(q_h.astype(bf16), k_h.astype(bf16),
                                      (((1,), (1,)), ((), ())),
                                      preferred_element_type=jnp.float32) * scale + bias
            s_h = s_h - jnp.max(s_h, axis=-1, keepdims=True)     # softmax stats in f32
            p = jnp.exp(s_h)
            p = p * pl.reciprocal(jnp.sum(p, axis=-1, keepdims=True), approx=True)
            ctx.append(jnp.dot(p.astype(bf16), v_h.astype(bf16),
                               preferred_element_type=jnp.float32))   # (S, HD)
        ctx = jnp.concatenate(ctx, axis=-1)                      # (S, H)
        # Single output projection on the concatenated heads.
        attn = jnp.dot(ctx.astype(bf16), wo, preferred_element_type=jnp.float32) + bo

        h1 = _layernorm(x + attn, ln1_g, ln1_b)
        ff = jnp.dot(h1.astype(bf16), w1_ref[l],
                     preferred_element_type=jnp.float32) + b1_ref[l]
        ff = jax.nn.gelu(ff)
        ff = jnp.dot(ff.astype(bf16), w2_ref[l],
                     preferred_element_type=jnp.float32) + b2
        return _layernorm(h1 + ff, ln2_g, ln2_b)

    # Residual stream stays on-chip across layers (L small & static -> fully unrolled).
    x = jax.lax.fori_loop(0, num_layers, layer, x, unroll=True)

    # ---- masked mean pooling (single (1,S)x(S,H) matmul) + fc_embed projection ----
    summed = jnp.dot(kmask, x, preferred_element_type=jnp.float32)       # (1, H)
    denom = jnp.maximum(jnp.sum(kmask, axis=-1, keepdims=True), 1e-9)    # clamp(min=1e-9)
    pooled = summed / denom
    emb = jnp.dot(pooled.astype(bf16), fc_ref[...],
                  preferred_element_type=jnp.float32)                     # (1, E)
    o_ref[...] = emb.reshape(1, 1, -1).astype(o_ref.dtype)


def text_encoder_forward(packed, input_ids, attention_mask):
    """Single pallas_call, grid=(B,) parallel. Returns (B, E) embeddings."""
    Bn, Sn = input_ids.shape
    ids_flat = input_ids.reshape(Bn * Sn).astype(jnp.int32)
    mask3 = attention_mask.reshape(Bn, 1, Sn).astype(jnp.float32)

    tensor_inputs = (mask3, packed['pos_emb'], packed['emb_ln'], packed['fc_embed'],
                     packed['w_qkv'], packed['b_qkv'], packed['w_o'], packed['vecs'],
                     packed['w1'], packed['b1'], packed['w2'])

    def const_spec(a):
        nd = a.ndim
        return pl.BlockSpec(a.shape, lambda b, ids, _nd=nd: (0,) * _nd)

    in_specs = [pl.BlockSpec((1, 1, Sn), lambda b, ids: (b, 0, 0)),      # attention mask row
                pl.BlockSpec((Sn, H), lambda b, ids: (0, 0))]            # position-emb slice
    in_specs += [const_spec(a) for a in tensor_inputs[2:]]               # weight stacks (VMEM resident)
    in_specs.append(pl.BlockSpec(memory_space=pl.ANY))                   # word_emb stays in HBM

    kernel = functools.partial(encoder_kernel, num_layers=L, num_heads=NH,
                               head_dim=HD, seq=Sn, hidden=H)
    out = pl.pallas_call(
        kernel,
        grid_spec=pltpu.PrefetchScalarGridSpec(
            num_scalar_prefetch=1,
            grid=(Bn,),
            in_specs=in_specs,
            out_specs=pl.BlockSpec((1, 1, E), lambda b, ids: (b, 0, 0)),
            scratch_shapes=[pltpu.VMEM((Sn, H), jnp.float32),            # gathered token embeddings
                            pltpu.SemaphoreType.DMA((Sn,))],
        ),
        out_shape=jax.ShapeDtypeStruct((Bn, 1, E), jnp.float32),
        compiler_params=pltpu.CompilerParams(dimension_semantics=("parallel",)),
    )(ids_flat, *tensor_inputs, packed['word_emb'])
    return out.reshape(Bn, E)


# ---------------- parameter construction (deterministic) and host-side packing ----------------
def init_params(key):
    def normal(k, shape, std):
        return std * jax.random.normal(k, shape, dtype=jnp.float32)

    keys = jax.random.split(key, 5 + L)
    params = {
        'word_emb': normal(keys[0], (VOCAB, H), 0.02),
        'pos_emb': normal(keys[1], (MAX_POS, H), 0.02),
        'emb_ln_g': 1.0 + normal(keys[2], (H,), 0.05),
        'emb_ln_b': normal(keys[3], (H,), 0.05),
        # TextEncoder.fc_embed: normal(std = hidden_size ** -0.5)
        'fc_embed': normal(keys[4], (H, E), H ** (-0.5)),
        'layers': [],
    }
    for l in range(L):
        lk = jax.random.split(keys[5 + l], 16)
        params['layers'].append({
            'wq': normal(lk[0], (H, H), 0.02), 'bq': normal(lk[1], (H,), 0.02),
            'wk': normal(lk[2], (H, H), 0.02), 'bk': normal(lk[3], (H,), 0.02),
            'wv': normal(lk[4], (H, H), 0.02), 'bv': normal(lk[5], (H,), 0.02),
            'wo': normal(lk[6], (H, H), 0.02), 'bo': normal(lk[7], (H,), 0.02),
            'ln1_g': 1.0 + normal(lk[8], (H,), 0.05), 'ln1_b': normal(lk[9], (H,), 0.05),
            'w1': normal(lk[10], (H, FF), 0.02), 'b1': normal(lk[11], (FF,), 0.02),
            'w2': normal(lk[12], (FF, H), 0.02), 'b2': normal(lk[13], (H,), 0.02),
            'ln2_g': 1.0 + normal(lk[14], (H,), 0.05), 'ln2_b': normal(lk[15], (H,), 0.05),
        })
    return params


def pack_params(params):
    """Fuse Q|K|V columns per layer, stack per-layer weights into (L, ...) arrays, cast matmul
    weights to bf16 (biases / LN params / pooling stay f32)."""
    layers = params['layers']
    bf = jnp.bfloat16
    return {
        'word_emb': params['word_emb'],                                            # f32, stays in HBM
        'pos_emb': params['pos_emb'],                                              # (MAX_POS, H) f32
        'emb_ln': jnp.stack([params['emb_ln_g'], params['emb_ln_b']]),             # (2, H) f32
        'fc_embed': params['fc_embed'].astype(bf),                                 # (H, E) bf16
        'w_qkv': jnp.stack([jnp.concatenate([lw['wq'], lw['wk'], lw['wv']], axis=1)
                            for lw in layers]).astype(bf),                         # (L, H, 3H) bf16
        'b_qkv': jnp.stack([jnp.concatenate([lw['bq'], lw['bk'], lw['bv']]).reshape(1, 3 * H)
                            for lw in layers]),                                    # (L, 1, 3H) f32
        'w_o': jnp.stack([lw['wo'] for lw in layers]).astype(bf),                  # (L, H, H) bf16
        'vecs': jnp.stack([jnp.stack([lw['bo'], lw['ln1_g'], lw['ln1_b'],
                                      lw['b2'], lw['ln2_g'], lw['ln2_b']])
                           for lw in layers]),                                     # (L, 6, H) f32
        'w1': jnp.stack([lw['w1'] for lw in layers]).astype(bf),                   # (L, H, FF) bf16
        'b1': jnp.stack([lw['b1'].reshape(1, FF) for lw in layers]),               # (L, 1, FF) f32
        'w2': jnp.stack([lw['w2'] for lw in layers]).astype(bf),                   # (L, FF, H) bf16
    }


# ---------------- pure-JAX f32 reference ----------------
def text_encoder_reference(params, input_ids, attention_mask):
    mask_f = attention_mask.astype(jnp.float32)
    tok = params['word_emb'][input_ids]
    pos = params['pos_emb'][:input_ids.shape[1]][None, :, :]
    x = _layernorm(tok + pos, params['emb_ln_g'], params['emb_ln_b'])
    amask = (mask_f[:, None, :] - 1.0) * 1e9
    for lw in params['layers']:
        q = x @ lw['wq'] + lw['bq']
        k = x @ lw['wk'] + lw['bk']
        v = x @ lw['wv'] + lw['bv']
        qh = q.reshape(B, S, NH, HD).transpose(0, 2, 1, 3)
        kh = k.reshape(B, S, NH, HD).transpose(0, 2, 1, 3)
        vh = v.reshape(B, S, NH, HD).transpose(0, 2, 1, 3)
        s = jnp.einsum('bhqd,bhkd->bhqk', qh, kh) / math.sqrt(HD) + amask[:, None, :, :]
        p = jax.nn.softmax(s, axis=-1)
        ctx = jnp.einsum('bhqk,bhkd->bhqd', p, vh).transpose(0, 2, 1, 3).reshape(B, S, H)
        attn_out = ctx @ lw['wo'] + lw['bo']
        h1 = _layernorm(x + attn_out, lw['ln1_g'], lw['ln1_b'])
        ff = jax.nn.gelu(h1 @ lw['w1'] + lw['b1']) @ lw['w2'] + lw['b2']
        x = _layernorm(h1 + ff, lw['ln2_g'], lw['ln2_b'])
    masked = x * mask_f[:, :, None]
    pooled = masked.sum(axis=1) / jnp.maximum(mask_f.sum(axis=1, keepdims=True), 1e-9)
    return pooled @ params['fc_embed']


if __name__ == "__main__":
    key = jax.random.PRNGKey(0)
    pkey, ikey = jax.random.split(key)
    params = init_params(pkey)
    packed = pack_params(params)

    input_ids = jax.random.randint(ikey, (B, S), 0, VOCAB, dtype=jnp.int32)
    attention_mask = jnp.array([[1, 1, 1, 1, 1, 1, 0, 0],
                                [1, 1, 1, 1, 0, 0, 0, 0]], dtype=jnp.int32)

    out = jax.block_until_ready(text_encoder_forward(packed, input_ids, attention_mask))
    ref = text_encoder_reference(params, input_ids, attention_mask)

    assert out.shape == (B, E), out.shape
    assert bool(jnp.all(jnp.isfinite(out)))
    max_err = float(jnp.max(jnp.abs(out - ref)))
    # bf16 matmul operands (f32 accumulate) vs. the pure-f32 reference -> bf16-level tolerance.
    assert jnp.allclose(out, ref, rtol=3e-2, atol=3e-2), max_err

    print("KERNEL_OK")
</pallas_src>

<mosaic_0001>
module attributes {stable_mosaic.version = 11 : i64} {
  func.func @encoder_kernel(%arg0: i32, %arg1: memref<16xi32, #tpu.memory_space<smem>>, %arg2: memref<1x1x8xf32, #tpu.memory_space<vmem>>, %arg3: memref<8x32xf32, #tpu.memory_space<vmem>>, %arg4: memref<2x32xf32, #tpu.memory_space<vmem>>, %arg5: memref<32x16xbf16, #tpu.memory_space<vmem>>, %arg6: memref<2x32x96xbf16, #tpu.memory_space<vmem>>, %arg7: memref<2x1x96xf32, #tpu.memory_space<vmem>>, %arg8: memref<2x32x32xbf16, #tpu.memory_space<vmem>>, %arg9: memref<2x6x32xf32, #tpu.memory_space<vmem>>, %arg10: memref<2x32x64xbf16, #tpu.memory_space<vmem>>, %arg11: memref<2x1x64xf32, #tpu.memory_space<vmem>>, %arg12: memref<2x64x32xbf16, #tpu.memory_space<vmem>>, %arg13: memref<64x32xf32, #tpu.memory_space<any>>, %arg14: memref<1x1x16xf32, #tpu.memory_space<vmem>>, %arg15: memref<8x32xf32, #tpu.memory_space<vmem>>, %arg16: memref<8x!tpu.dma_semaphore, #tpu.memory_space<semaphore_mem>>) attributes {dimension_semantics = [#tpu.dimension_semantics<parallel>], iteration_bounds = array<i64: 2>, scalar_prefetch = 1 : i64, scratch_operands = 2 : i64, tpu.core_type = #tpu.core_type<tc>, window_params = [{transform_indices = @transform_0, window_bounds = array<i64: 1, 1, 8>}, {transform_indices = @transform_1, window_bounds = array<i64: 8, 32>}, {pipeline_mode = #tpu.pipeline_mode<synchronous>, transform_indices = @transform_2, window_bounds = array<i64: 2, 32>}, {pipeline_mode = #tpu.pipeline_mode<synchronous>, transform_indices = @transform_3, window_bounds = array<i64: 32, 16>}, {pipeline_mode = #tpu.pipeline_mode<synchronous>, transform_indices = @transform_4, window_bounds = array<i64: 2, 32, 96>}, {pipeline_mode = #tpu.pipeline_mode<synchronous>, transform_indices = @transform_5, window_bounds = array<i64: 2, 1, 96>}, {pipeline_mode = #tpu.pipeline_mode<synchronous>, transform_indices = @transform_6, window_bounds = array<i64: 2, 32, 32>}, {pipeline_mode = #tpu.pipeline_mode<synchronous>, transform_indices = @transform_7, window_bounds = array<i64: 2, 6, 32>}, {pipeline_mode = #tpu.pipeline_mode<synchronous>, transform_indices = @transform_8, window_bounds = array<i64: 2, 32, 64>}, {pipeline_mode = #tpu.pipeline_mode<synchronous>, transform_indices = @transform_9, window_bounds = array<i64: 2, 1, 64>}, {pipeline_mode = #tpu.pipeline_mode<synchronous>, transform_indices = @transform_10, window_bounds = array<i64: 2, 64, 32>}, {}, {transform_indices = @transform_12, window_bounds = array<i64: 1, 1, 16>}]} {
    %c8_i32 = arith.constant 8 : i32
    %0 = arith.muli %arg0, %c8_i32 : i32
    %c0_i32 = arith.constant 0 : i32
    %1 = arith.addi %0, %c0_i32 : i32
    %2 = arith.index_cast %1 : i32 to index
    %3 = memref.load %arg1[%2] : memref<16xi32, #tpu.memory_space<smem>>
    %c0_i32_0 = arith.constant 0 : i32
    %c0_i32_1 = arith.constant 0 : i32
    %4 = tpu.memref_slice %arg13[%3, %c0_i32_1] : memref<64x32xf32, #tpu.memory_space<any>> -> memref<1x32xf32, #tpu.memory_space<any>>
    %c0_i32_2 = arith.constant 0 : i32
    %c0_i32_3 = arith.constant 0 : i32
    %5 = tpu.memref_slice %arg15[%c0_i32_2, %c0_i32_3] : memref<8x32xf32, #tpu.memory_space<vmem>> -> memref<1x32xf32, #tpu.memory_space<vmem>>
    %6 = tpu.memref_slice %arg16[%c0_i32_0] : memref<8x!tpu.dma_semaphore, #tpu.memory_space<semaphore_mem>> -> memref<1x!tpu.dma_semaphore, #tpu.memory_space<semaphore_mem>>
    %7 = tpu.memref_squeeze %6 : memref<1x!tpu.dma_semaphore, #tpu.memory_space<semaphore_mem>> -> memref<!tpu.dma_semaphore, #tpu.memory_space<semaphore_mem>>
    tpu.enqueue_dma source(%4 : memref<1x32xf32, #tpu.memory_space<any>>) target(%5 : memref<1x32xf32, #tpu.memory_space<vmem>>) target_semaphore(%7 : memref<!tpu.dma_semaphore, #tpu.memory_space<semaphore_mem>>)
    %c8_i32_4 = arith.constant 8 : i32
    %8 = arith.muli %arg0, %c8_i32_4 : i32
    %c1_i32 = arith.constant 1 : i32
    %9 = arith.addi %8, %c1_i32 : i32
    %10 = arith.index_cast %9 : i32 to index
    %11 = memref.load %arg1[%10] : memref<16xi32, #tpu.memory_space<smem>>
    %c1_i32_5 = arith.constant 1 : i32
    %c0_i32_6 = arith.constant 0 : i32
    %12 = tpu.memref_slice %arg13[%11, %c0_i32_6] : memref<64x32xf32, #tpu.memory_space<any>> -> memref<1x32xf32, #tpu.memory_space<any>>
    %c1_i32_7 = arith.constant 1 : i32
    %c0_i32_8 = arith.constant 0 : i32
    %13 = tpu.memref_slice %arg15[%c1_i32_7, %c0_i32_8] : memref<8x32xf32, #tpu.memory_space<vmem>> -> memref<1x32xf32, #tpu.memory_space<vmem>>
    %14 = tpu.memref_slice %arg16[%c1_i32_5] : memref<8x!tpu.dma_semaphore, #tpu.memory_space<semaphore_mem>> -> memref<1x!tpu.dma_semaphore, #tpu.memory_space<semaphore_mem>>
    %15 = tpu.memref_squeeze %14 : memref<1x!tpu.dma_semaphore, #tpu.memory_space<semaphore_mem>> -> memref<!tpu.dma_semaphore, #tpu.memory_space<semaphore_mem>>
    tpu.enqueue_dma source(%12 : memref<1x32xf32, #tpu.memory_space<any>>) target(%13 : memref<1x32xf32, #tpu.memory_space<vmem>>) target_semaphore(%15 : memref<!tpu.dma_semaphore, #tpu.memory_space<semaphore_mem>>)
    %c8_i32_9 = arith.constant 8 : i32
    %16 = arith.muli %arg0, %c8_i32_9 : i32
    %c2_i32 = arith.constant 2 : i32
    %17 = arith.addi %16, %c2_i32 : i32
    %18 = arith.index_cast %17 : i32 to index
    %19 = memref.load %arg1[%18] : memref<16xi32, #tpu.memory_space<smem>>
    %c2_i32_10 = arith.constant 2 : i32
    %c0_i32_11 = arith.constant 0 : i32
    %20 = tpu.memref_slice %arg13[%19, %c0_i32_11] : memref<64x32xf32, #tpu.memory_space<any>> -> memref<1x32xf32, #tpu.memory_space<any>>
    %c2_i32_12 = arith.constant 2 : i32
    %c0_i32_13 = arith.constant 0 : i32
    %21 = tpu.memref_slice %arg15[%c2_i32_12, %c0_i32_13] : memref<8x32xf32, #tpu.memory_space<vmem>> -> memref<1x32xf32, #tpu.memory_space<vmem>>
    %22 = tpu.memref_slice %arg16[%c2_i32_10] : memref<8x!tpu.dma_semaphore, #tpu.memory_space<semaphore_mem>> -> memref<1x!tpu.dma_semaphore, #tpu.memory_space<semaphore_mem>>
    %23 = tpu.memref_squeeze %22 : memref<1x!tpu.dma_semaphore, #tpu.memory_space<semaphore_mem>> -> memref<!tpu.dma_semaphore, #tpu.memory_space<semaphore_mem>>
    tpu.enqueue_dma source(%20 : memref<1x32xf32, #tpu.memory_space<any>>) target(%21 : memref<1x32xf32, #tpu.memory_space<vmem>>) target_semaphore(%23 : memref<!tpu.dma_semaphore, #tpu.memory_space<semaphore_mem>>)
    %c8_i32_14 = arith.constant 8 : i32
    %24 = arith.muli %arg0, %c8_i32_14 : i32
    %c3_i32 = arith.constant 3 : i32
    %25 = arith.addi %24, %c3_i32 : i32
    %26 = arith.index_cast %25 : i32 to index
    %27 = memref.load %arg1[%26] : memref<16xi32, #tpu.memory_space<smem>>
    %c3_i32_15 = arith.constant 3 : i32
    %c0_i32_16 = arith.constant 0 : i32
    %28 = tpu.memref_slice %arg13[%27, %c0_i32_16] : memref<64x32xf32, #tpu.memory_space<any>> -> memref<1x32xf32, #tpu.memory_space<any>>
    %c3_i32_17 = arith.constant 3 : i32
    %c0_i32_18 = arith.constant 0 : i32
    %29 = tpu.memref_slice %arg15[%c3_i32_17, %c0_i32_18] : memref<8x32xf32, #tpu.memory_space<vmem>> -> memref<1x32xf32, #tpu.memory_space<vmem>>
    %30 = tpu.memref_slice %arg16[%c3_i32_15] : memref<8x!tpu.dma_semaphore, #tpu.memory_space<semaphore_mem>> -> memref<1x!tpu.dma_semaphore, #tpu.memory_space<semaphore_mem>>
    %31 = tpu.memref_squeeze %30 : memref<1x!tpu.dma_semaphore, #tpu.memory_space<semaphore_mem>> -> memref<!tpu.dma_semaphore, #tpu.memory_space<semaphore_mem>>
    tpu.enqueue_dma source(%28 : memref<1x32xf32, #tpu.memory_space<any>>) target(%29 : memref<1x32xf32, #tpu.memory_space<vmem>>) target_semaphore(%31 : memref<!tpu.dma_semaphore, #tpu.memory_space<semaphore_mem>>)
    %c8_i32_19 = arith.constant 8 : i32
    %32 = arith.muli %arg0, %c8_i32_19 : i32
    %c4_i32 = arith.constant 4 : i32
    %33 = arith.addi %32, %c4_i32 : i32
    %34 = arith.index_cast %33 : i32 to index
    %35 = memref.load %arg1[%34] : memref<16xi32, #tpu.memory_space<smem>>
    %c4_i32_20 = arith.constant 4 : i32
    %c0_i32_21 = arith.constant 0 : i32
    %36 = tpu.memref_slice %arg13[%35, %c0_i32_21] : memref<64x32xf32, #tpu.memory_space<any>> -> memref<1x32xf32, #tpu.memory_space<any>>
    %c4_i32_22 = arith.constant 4 : i32
    %c0_i32_23 = arith.constant 0 : i32
    %37 = tpu.memref_slice %arg15[%c4_i32_22, %c0_i32_23] : memref<8x32xf32, #tpu.memory_space<vmem>> -> memref<1x32xf32, #tpu.memory_space<vmem>>
    %38 = tpu.memref_slice %arg16[%c4_i32_20] : memref<8x!tpu.dma_semaphore, #tpu.memory_space<semaphore_mem>> -> memref<1x!tpu.dma_semaphore, #tpu.memory_space<semaphore_mem>>
    %39 = tpu.memref_squeeze %38 : memref<1x!tpu.dma_semaphore, #tpu.memory_space<semaphore_mem>> -> memref<!tpu.dma_semaphore, #tpu.memory_space<semaphore_mem>>
    tpu.enqueue_dma source(%36 : memref<1x32xf32, #tpu.memory_space<any>>) target(%37 : memref<1x32xf32, #tpu.memory_space<vmem>>) target_semaphore(%39 : memref<!tpu.dma_semaphore, #tpu.memory_space<semaphore_mem>>)
    %c8_i32_24 = arith.constant 8 : i32
    %40 = arith.muli %arg0, %c8_i32_24 : i32
    %c5_i32 = arith.constant 5 : i32
    %41 = arith.addi %40, %c5_i32 : i32
    %42 = arith.index_cast %41 : i32 to index
    %43 = memref.load %arg1[%42] : memref<16xi32, #tpu.memory_space<smem>>
    %c5_i32_25 = arith.constant 5 : i32
    %c0_i32_26 = arith.constant 0 : i32
    %44 = tpu.memref_slice %arg13[%43, %c0_i32_26] : memref<64x32xf32, #tpu.memory_space<any>> -> memref<1x32xf32, #tpu.memory_space<any>>
    %c5_i32_27 = arith.constant 5 : i32
    %c0_i32_28 = arith.constant 0 : i32
    %45 = tpu.memref_slice %arg15[%c5_i32_27, %c0_i32_28] : memref<8x32xf32, #tpu.memory_space<vmem>> -> memref<1x32xf32, #tpu.memory_space<vmem>>
    %46 = tpu.memref_slice %arg16[%c5_i32_25] : memref<8x!tpu.dma_semaphore, #tpu.memory_space<semaphore_mem>> -> memref<1x!tpu.dma_semaphore, #tpu.memory_space<semaphore_mem>>
    %47 = tpu.memref_squeeze %46 : memref<1x!tpu.dma_semaphore, #tpu.memory_space<semaphore_mem>> -> memref<!tpu.dma_semaphore, #tpu.memory_space<semaphore_mem>>
    tpu.enqueue_dma source(%44 : memref<1x32xf32, #tpu.memory_space<any>>) target(%45 : memref<1x32xf32, #tpu.memory_space<vmem>>) target_semaphore(%47 : memref<!tpu.dma_semaphore, #tpu.memory_space<semaphore_mem>>)
    %c8_i32_29 = arith.constant 8 : i32
    %48 = arith.muli %arg0, %c8_i32_29 : i32
    %c6_i32 = arith.constant 6 : i32
    %49 = arith.addi %48, %c6_i32 : i32
    %50 = arith.index_cast %49 : i32 to index
    %51 = memref.load %arg1[%50] : memref<16xi32, #tpu.memory_space<smem>>
    %c6_i32_30 = arith.constant 6 : i32
    %c0_i32_31 = arith.constant 0 : i32
    %52 = tpu.memref_slice %arg13[%51, %c0_i32_31] : memref<64x32xf32, #tpu.memory_space<any>> -> memref<1x32xf32, #tpu.memory_space<any>>
    %c6_i32_32 = arith.constant 6 : i32
    %c0_i32_33 = arith.constant 0 : i32
    %53 = tpu.memref_slice %arg15[%c6_i32_32, %c0_i32_33] : memref<8x32xf32, #tpu.memory_space<vmem>> -> memref<1x32xf32, #tpu.memory_space<vmem>>
    %54 = tpu.memref_slice %arg16[%c6_i32_30] : memref<8x!tpu.dma_semaphore, #tpu.memory_space<semaphore_mem>> -> memref<1x!tpu.dma_semaphore, #tpu.memory_space<semaphore_mem>>
    %55 = tpu.memref_squeeze %54 : memref<1x!tpu.dma_semaphore, #tpu.memory_space<semaphore_mem>> -> memref<!tpu.dma_semaphore, #tpu.memory_space<semaphore_mem>>
    tpu.enqueue_dma source(%52 : memref<1x32xf32, #tpu.memory_space<any>>) target(%53 : memref<1x32xf32, #tpu.memory_space<vmem>>) target_semaphore(%55 : memref<!tpu.dma_semaphore, #tpu.memory_space<semaphore_mem>>)
    %c8_i32_34 = arith.constant 8 : i32
    %56 = arith.muli %arg0, %c8_i32_34 : i32
    %c7_i32 = arith.constant 7 : i32
    %57 = arith.addi %56, %c7_i32 : i32
    %58 = arith.index_cast %57 : i32 to index
    %59 = memref.load %arg1[%58] : memref<16xi32, #tpu.memory_space<smem>>
    %c7_i32_35 = arith.constant 7 : i32
    %c0_i32_36 = arith.constant 0 : i32
    %60 = tpu.memref_slice %arg13[%59, %c0_i32_36] : memref<64x32xf32, #tpu.memory_space<any>> -> memref<1x32xf32, #tpu.memory_space<any>>
    %c7_i32_37 = arith.constant 7 : i32
    %c0_i32_38 = arith.constant 0 : i32
    %61 = tpu.memref_slice %arg15[%c7_i32_37, %c0_i32_38] : memref<8x32xf32, #tpu.memory_space<vmem>> -> memref<1x32xf32, #tpu.memory_space<vmem>>
    %62 = tpu.memref_slice %arg16[%c7_i32_35] : memref<8x!tpu.dma_semaphore, #tpu.memory_space<semaphore_mem>> -> memref<1x!tpu.dma_semaphore, #tpu.memory_space<semaphore_mem>>
    %63 = tpu.memref_squeeze %62 : memref<1x!tpu.dma_semaphore, #tpu.memory_space<semaphore_mem>> -> memref<!tpu.dma_semaphore, #tpu.memory_space<semaphore_mem>>
    tpu.enqueue_dma source(%60 : memref<1x32xf32, #tpu.memory_space<any>>) target(%61 : memref<1x32xf32, #tpu.memory_space<vmem>>) target_semaphore(%63 : memref<!tpu.dma_semaphore, #tpu.memory_space<semaphore_mem>>)
    %c0_i32_39 = arith.constant 0 : i32
    %c0_i32_40 = arith.constant 0 : i32
    %c0_i32_41 = arith.constant 0 : i32
    %64 = tpu.memref_slice %arg13[%c0_i32_40, %c0_i32_41] : memref<64x32xf32, #tpu.memory_space<any>> -> memref<1x32xf32, #tpu.memory_space<any>>
    %c0_i32_42 = arith.constant 0 : i32
    %c0_i32_43 = arith.constant 0 : i32
    %65 = tpu.memref_slice %arg15[%c0_i32_42, %c0_i32_43] : memref<8x32xf32, #tpu.memory_space<vmem>> -> memref<1x32xf32, #tpu.memory_space<vmem>>
    %66 = tpu.memref_slice %arg16[%c0_i32_39] : memref<8x!tpu.dma_semaphore, #tpu.memory_space<semaphore_mem>> -> memref<1x!tpu.dma_semaphore, #tpu.memory_space<semaphore_mem>>
    %67 = tpu.memref_squeeze %66 : memref<1x!tpu.dma_semaphore, #tpu.memory_space<semaphore_mem>> -> memref<!tpu.dma_semaphore, #tpu.memory_space<semaphore_mem>>
    tpu.wait_dma2 semaphore(%67 : memref<!tpu.dma_semaphore, #tpu.memory_space<semaphore_mem>>) src(%64 : memref<1x32xf32, #tpu.memory_space<any>>) dst(%65 : memref<1x32xf32, #tpu.memory_space<vmem>>)
    %c1_i32_44 = arith.constant 1 : i32
    %c0_i32_45 = arith.constant 0 : i32
    %c0_i32_46 = arith.constant 0 : i32
    %68 = tpu.memref_slice %arg13[%c0_i32_45, %c0_i32_46] : memref<64x32xf32, #tpu.memory_space<any>> -> memref<1x32xf32, #tpu.memory_space<any>>
    %c1_i32_47 = arith.constant 1 : i32
    %c0_i32_48 = arith.constant 0 : i32
    %69 = tpu.memref_slice %arg15[%c1_i32_47, %c0_i32_48] : memref<8x32xf32, #tpu.memory_space<vmem>> -> memref<1x32xf32, #tpu.memory_space<vmem>>
    %70 = tpu.memref_slice %arg16[%c1_i32_44] : memref<8x!tpu.dma_semaphore, #tpu.memory_space<semaphore_mem>> -> memref<1x!tpu.dma_semaphore, #tpu.memory_space<semaphore_mem>>
    %71 = tpu.memref_squeeze %70 : memref<1x!tpu.dma_semaphore, #tpu.memory_space<semaphore_mem>> -> memref<!tpu.dma_semaphore, #tpu.memory_space<semaphore_mem>>
    tpu.wait_dma2 semaphore(%71 : memref<!tpu.dma_semaphore, #tpu.memory_space<semaphore_mem>>) src(%68 : memref<1x32xf32, #tpu.memory_space<any>>) dst(%69 : memref<1x32xf32, #tpu.memory_space<vmem>>)
    %c2_i32_49 = arith.constant 2 : i32
    %c0_i32_50 = arith.constant 0 : i32
    %c0_i32_51 = arith.constant 0 : i32
    %72 = tpu.memref_slice %arg13[%c0_i32_50, %c0_i32_51] : memref<64x32xf32, #tpu.memory_space<any>> -> memref<1x32xf32, #tpu.memory_space<any>>
    %c2_i32_52 = arith.constant 2 : i32
    %c0_i32_53 = arith.constant 0 : i32
    %73 = tpu.memref_slice %arg15[%c2_i32_52, %c0_i32_53] : memref<8x32xf32, #tpu.memory_space<vmem>> -> memref<1x32xf32, #tpu.memory_space<vmem>>
    %74 = tpu.memref_slice %arg16[%c2_i32_49] : memref<8x!tpu.dma_semaphore, #tpu.memory_space<semaphore_mem>> -> memref<1x!tpu.dma_semaphore, #tpu.memory_space<semaphore_mem>>
    %75 = tpu.memref_squeeze %74 : memref<1x!tpu.dma_semaphore, #tpu.memory_space<semaphore_mem>> -> memref<!tpu.dma_semaphore, #tpu.memory_space<semaphore_mem>>
    tpu.wait_dma2 semaphore(%75 : memref<!tpu.dma_semaphore, #tpu.memory_space<semaphore_mem>>) src(%72 : memref<1x32xf32, #tpu.memory_space<any>>) dst(%73 : memref<1x32xf32, #tpu.memory_space<vmem>>)
    %c3_i32_54 = arith.constant 3 : i32
    %c0_i32_55 = arith.constant 0 : i32
    %c0_i32_56 = arith.constant 0 : i32
    %76 = tpu.memref_slice %arg13[%c0_i32_55, %c0_i32_56] : memref<64x32xf32, #tpu.memory_space<any>> -> memref<1x32xf32, #tpu.memory_space<any>>
    %c3_i32_57 = arith.constant 3 : i32
    %c0_i32_58 = arith.constant 0 : i32
    %77 = tpu.memref_slice %arg15[%c3_i32_57, %c0_i32_58] : memref<8x32xf32, #tpu.memory_space<vmem>> -> memref<1x32xf32, #tpu.memory_space<vmem>>
    %78 = tpu.memref_slice %arg16[%c3_i32_54] : memref<8x!tpu.dma_semaphore, #tpu.memory_space<semaphore_mem>> -> memref<1x!tpu.dma_semaphore, #tpu.memory_space<semaphore_mem>>
    %79 = tpu.memref_squeeze %78 : memref<1x!tpu.dma_semaphore, #tpu.memory_space<semaphore_mem>> -> memref<!tpu.dma_semaphore, #tpu.memory_space<semaphore_mem>>
    tpu.wait_dma2 semaphore(%79 : memref<!tpu.dma_semaphore, #tpu.memory_space<semaphore_mem>>) src(%76 : memref<1x32xf32, #tpu.memory_space<any>>) dst(%77 : memref<1x32xf32, #tpu.memory_space<vmem>>)
    %c4_i32_59 = arith.constant 4 : i32
    %c0_i32_60 = arith.constant 0 : i32
    %c0_i32_61 = arith.constant 0 : i32
    %80 = tpu.memref_slice %arg13[%c0_i32_60, %c0_i32_61] : memref<64x32xf32, #tpu.memory_space<any>> -> memref<1x32xf32, #tpu.memory_space<any>>
    %c4_i32_62 = arith.constant 4 : i32
    %c0_i32_63 = arith.constant 0 : i32
    %81 = tpu.memref_slice %arg15[%c4_i32_62, %c0_i32_63] : memref<8x32xf32, #tpu.memory_space<vmem>> -> memref<1x32xf32, #tpu.memory_space<vmem>>
    %82 = tpu.memref_slice %arg16[%c4_i32_59] : memref<8x!tpu.dma_semaphore, #tpu.memory_space<semaphore_mem>> -> memref<1x!tpu.dma_semaphore, #tpu.memory_space<semaphore_mem>>
    %83 = tpu.memref_squeeze %82 : memref<1x!tpu.dma_semaphore, #tpu.memory_space<semaphore_mem>> -> memref<!tpu.dma_semaphore, #tpu.memory_space<semaphore_mem>>
    tpu.wait_dma2 semaphore(%83 : memref<!tpu.dma_semaphore, #tpu.memory_space<semaphore_mem>>) src(%80 : memref<1x32xf32, #tpu.memory_space<any>>) dst(%81 : memref<1x32xf32, #tpu.memory_space<vmem>>)
    %c5_i32_64 = arith.constant 5 : i32
    %c0_i32_65 = arith.constant 0 : i32
    %c0_i32_66 = arith.constant 0 : i32
    %84 = tpu.memref_slice %arg13[%c0_i32_65, %c0_i32_66] : memref<64x32xf32, #tpu.memory_space<any>> -> memref<1x32xf32, #tpu.memory_space<any>>
    %c5_i32_67 = arith.constant 5 : i32
    %c0_i32_68 = arith.constant 0 : i32
    %85 = tpu.memref_slice %arg15[%c5_i32_67, %c0_i32_68] : memref<8x32xf32, #tpu.memory_space<vmem>> -> memref<1x32xf32, #tpu.memory_space<vmem>>
    %86 = tpu.memref_slice %arg16[%c5_i32_64] : memref<8x!tpu.dma_semaphore, #tpu.memory_space<semaphore_mem>> -> memref<1x!tpu.dma_semaphore, #tpu.memory_space<semaphore_mem>>
    %87 = tpu.memref_squeeze %86 : memref<1x!tpu.dma_semaphore, #tpu.memory_space<semaphore_mem>> -> memref<!tpu.dma_semaphore, #tpu.memory_space<semaphore_mem>>
    tpu.wait_dma2 semaphore(%87 : memref<!tpu.dma_semaphore, #tpu.memory_space<semaphore_mem>>) src(%84 : memref<1x32xf32, #tpu.memory_space<any>>) dst(%85 : memref<1x32xf32, #tpu.memory_space<vmem>>)
    %c6_i32_69 = arith.constant 6 : i32
    %c0_i32_70 = arith.constant 0 : i32
    %c0_i32_71 = arith.constant 0 : i32
    %88 = tpu.memref_slice %arg13[%c0_i32_70, %c0_i32_71] : memref<64x32xf32, #tpu.memory_space<any>> -> memref<1x32xf32, #tpu.memory_space<any>>
    %c6_i32_72 = arith.constant 6 : i32
    %c0_i32_73 = arith.constant 0 : i32
    %89 = tpu.memref_slice %arg15[%c6_i32_72, %c0_i32_73] : memref<8x32xf32, #tpu.memory_space<vmem>> -> memref<1x32xf32, #tpu.memory_space<vmem>>
    %90 = tpu.memref_slice %arg16[%c6_i32_69] : memref<8x!tpu.dma_semaphore, #tpu.memory_space<semaphore_mem>> -> memref<1x!tpu.dma_semaphore, #tpu.memory_space<semaphore_mem>>
    %91 = tpu.memref_squeeze %90 : memref<1x!tpu.dma_semaphore, #tpu.memory_space<semaphore_mem>> -> memref<!tpu.dma_semaphore, #tpu.memory_space<semaphore_mem>>
    tpu.wait_dma2 semaphore(%91 : memref<!tpu.dma_semaphore, #tpu.memory_space<semaphore_mem>>) src(%88 : memref<1x32xf32, #tpu.memory_space<any>>) dst(%89 : memref<1x32xf32, #tpu.memory_space<vmem>>)
    %c7_i32_74 = arith.constant 7 : i32
    %c0_i32_75 = arith.constant 0 : i32
    %c0_i32_76 = arith.constant 0 : i32
    %92 = tpu.memref_slice %arg13[%c0_i32_75, %c0_i32_76] : memref<64x32xf32, #tpu.memory_space<any>> -> memref<1x32xf32, #tpu.memory_space<any>>
    %c7_i32_77 = arith.constant 7 : i32
    %c0_i32_78 = arith.constant 0 : i32
    %93 = tpu.memref_slice %arg15[%c7_i32_77, %c0_i32_78] : memref<8x32xf32, #tpu.memory_space<vmem>> -> memref<1x32xf32, #tpu.memory_space<vmem>>
    %94 = tpu.memref_slice %arg16[%c7_i32_74] : memref<8x!tpu.dma_semaphore, #tpu.memory_space<semaphore_mem>> -> memref<1x!tpu.dma_semaphore, #tpu.memory_space<semaphore_mem>>
    %95 = tpu.memref_squeeze %94 : memref<1x!tpu.dma_semaphore, #tpu.memory_space<semaphore_mem>> -> memref<!tpu.dma_semaphore, #tpu.memory_space<semaphore_mem>>
    tpu.wait_dma2 semaphore(%95 : memref<!tpu.dma_semaphore, #tpu.memory_space<semaphore_mem>>) src(%92 : memref<1x32xf32, #tpu.memory_space<any>>) dst(%93 : memref<1x32xf32, #tpu.memory_space<vmem>>)
    %c0 = arith.constant 0 : index
    %c0_79 = arith.constant 0 : index
    %96 = vector.load %arg15[%c0, %c0_79] : memref<8x32xf32, #tpu.memory_space<vmem>>, vector<8x32xf32>
    %c0_80 = arith.constant 0 : index
    %c0_81 = arith.constant 0 : index
    %97 = vector.load %arg3[%c0_80, %c0_81] : memref<8x32xf32, #tpu.memory_space<vmem>>, vector<8x32xf32>
    %98 = arith.addf %96, %97 : vector<8x32xf32>
    %c0_82 = arith.constant 0 : index
    %c0_83 = arith.constant 0 : index
    %99 = vector.load %arg4[%c0_82, %c0_83] : memref<2x32xf32, #tpu.memory_space<vmem>>, vector<1x32xf32>
    %c1 = arith.constant 1 : index
    %c0_84 = arith.constant 0 : index
    %100 = vector.load %arg4[%c1, %c0_84] : memref<2x32xf32, #tpu.memory_space<vmem>>, vector<1x32xf32>
    %cst = arith.constant dense<0.000000e+00> : vector<8xf32>
    %101 = vector.multi_reduction <add>, %98, %cst [1] : vector<8x32xf32> to vector<8xf32>
    %102 = vector.shape_cast %101 : vector<8xf32> to vector<8x1xf32>
    %cst_85 = arith.constant 3.200000e+01 : f32
    %103 = vector.broadcast %cst_85 : f32 to vector<8x1xf32>
    %104 = arith.divf %102, %103 : vector<8x1xf32>
    %105 = vector.broadcast %104 : vector<8x1xf32> to vector<8x32xf32>
    %106 = arith.subf %98, %105 : vector<8x32xf32>
    %107 = arith.mulf %106, %106 : vector<8x32xf32>
    %cst_86 = arith.constant dense<0.000000e+00> : vector<8xf32>
    %108 = vector.multi_reduction <add>, %107, %cst_86 [1] : vector<8x32xf32> to vector<8xf32>
    %109 = vector.shape_cast %108 : vector<8xf32> to vector<8x1xf32>
    %cst_87 = arith.constant 3.200000e+01 : f32
    %110 = vector.broadcast %cst_87 : f32 to vector<8x1xf32>
    %111 = arith.divf %109, %110 : vector<8x1xf32>
    %112 = vector.broadcast %104 : vector<8x1xf32> to vector<8x32xf32>
    %113 = arith.subf %98, %112 : vector<8x32xf32>
    %cst_88 = arith.constant 9.99999996E-13 : f32
    %114 = vector.broadcast %cst_88 : f32 to vector<8x1xf32>
    %115 = arith.addf %111, %114 : vector<8x1xf32>
    %116 = math.rsqrt %115 : vector<8x1xf32>
    %117 = vector.broadcast %116 : vector<8x1xf32> to vector<8x32xf32>
    %118 = arith.mulf %113, %117 : vector<8x32xf32>
    %119 = vector.broadcast %99 : vector<1x32xf32> to vector<8x32xf32>
    %120 = arith.mulf %118, %119 : vector<8x32xf32>
    %121 = vector.broadcast %100 : vector<1x32xf32> to vector<8x32xf32>
    %122 = arith.addf %120, %121 : vector<8x32xf32>
    %c0_89 = arith.constant 0 : index
    %c0_90 = arith.constant 0 : index
    %c0_91 = arith.constant 0 : index
    %123 = vector.load %arg2[%c0_89, %c0_90, %c0_91] : memref<1x1x8xf32, #tpu.memory_space<vmem>>, vector<1x1x8xf32>
    %124 = vector.shape_cast %123 : vector<1x1x8xf32> to vector<1x8xf32>
    %cst_92 = arith.constant 5.000000e-01 : f32
    %125 = vector.broadcast %cst_92 : f32 to vector<1x8xf32>
    %126 = arith.cmpf ogt, %124, %125 : vector<1x8xf32>
    %cst_93 = arith.constant 0.000000e+00 : f32
    %cst_94 = arith.constant -1.000000e+09 : f32
    %127 = vector.broadcast %cst_93 : f32 to vector<1x8xf32>
    %128 = vector.broadcast %cst_94 : f32 to vector<1x8xf32>
    %129 = arith.select %126, %127, %128 : vector<1x8xi1>, vector<1x8xf32>
    %c0_i32_95 = arith.constant 0 : i32
    %130 = arith.index_cast %c0_i32_95 : i32 to index
    %c0_96 = arith.constant 0 : index
    %c0_97 = arith.constant 0 : index
    %131 = vector.load %arg6[%130, %c0_96, %c0_97] : memref<2x32x96xbf16, #tpu.memory_space<vmem>>, vector<1x32x96xbf16>
    %132 = vector.shape_cast %131 : vector<1x32x96xbf16> to vector<32x96xbf16>
    %133 = arith.index_cast %c0_i32_95 : i32 to index
    %c0_98 = arith.constant 0 : index
    %c0_99 = arith.constant 0 : index
    %134 = vector.load %arg7[%133, %c0_98, %c0_99] : memref<2x1x96xf32, #tpu.memory_space<vmem>>, vector<1x1x96xf32>
    %135 = vector.shape_cast %134 : vector<1x1x96xf32> to vector<1x96xf32>
    %136 = arith.index_cast %c0_i32_95 : i32 to index
    %c0_100 = arith.constant 0 : index
    %c0_101 = arith.constant 0 : index
    %137 = vector.load %arg8[%136, %c0_100, %c0_101] : memref<2x32x32xbf16, #tpu.memory_space<vmem>>, vector<1x32x32xbf16>
    %138 = vector.shape_cast %137 : vector<1x32x32xbf16> to vector<32x32xbf16>
    %139 = arith.index_cast %c0_i32_95 : i32 to index
    %c0_102 = arith.constant 0 : index
    %c0_103 = arith.constant 0 : index
    %140 = vector.load %arg9[%139, %c0_102, %c0_103] : memref<2x6x32xf32, #tpu.memory_space<vmem>>, vector<1x6x32xf32>
    %141 = vector.shape_cast %140 : vector<1x6x32xf32> to vector<6x32xf32>
    %142 = vector.extract_strided_slice %141 {offsets = [0, 0], sizes = [1, 32], strides = [1, 1]} : vector<6x32xf32> to vector<1x32xf32>
    %143 = vector.extract_strided_slice %141 {offsets = [1, 0], sizes = [1, 32], strides = [1, 1]} : vector<6x32xf32> to vector<1x32xf32>
    %144 = vector.extract_strided_slice %141 {offsets = [2, 0], sizes = [1, 32], strides = [1, 1]} : vector<6x32xf32> to vector<1x32xf32>
    %145 = vector.extract_strided_slice %141 {offsets = [3, 0], sizes = [1, 32], strides = [1, 1]} : vector<6x32xf32> to vector<1x32xf32>
    %146 = vector.extract_strided_slice %141 {offsets = [4, 0], sizes = [1, 32], strides = [1, 1]} : vector<6x32xf32> to vector<1x32xf32>
    %147 = vector.extract_strided_slice %141 {offsets = [5, 0], sizes = [1, 32], strides = [1, 1]} : vector<6x32xf32> to vector<1x32xf32>
    %148 = arith.truncf %122 : vector<8x32xf32> to vector<8x32xbf16>
    %cst_104 = arith.constant dense<0.000000e+00> : vector<8x96xf32>
    %149 = tpu.matmul %148, %132, %cst_104 {dimension_numbers = #tpu.dot_dimension_numbers<[1], [0], [0], [1], [0, 0, 1, 1], [], []>} : vector<8x32xbf16>, vector<32x96xbf16>, vector<8x96xf32> -> vector<8x96xf32>
    %150 = vector.broadcast %135 : vector<1x96xf32> to vector<8x96xf32>
    %151 = arith.addf %149, %150 : vector<8x96xf32>
    %152 = vector.extract_strided_slice %151 {offsets = [0, 0], sizes = [8, 16], strides = [1, 1]} : vector<8x96xf32> to vector<8x16xf32>
    %153 = vector.extract_strided_slice %151 {offsets = [0, 32], sizes = [8, 16], strides = [1, 1]} : vector<8x96xf32> to vector<8x16xf32>
    %154 = vector.extract_strided_slice %151 {offsets = [0, 64], sizes = [8, 16], strides = [1, 1]} : vector<8x96xf32> to vector<8x16xf32>
    %155 = arith.truncf %152 : vector<8x16xf32> to vector<8x16xbf16>
    %156 = arith.truncf %153 : vector<8x16xf32> to vector<8x16xbf16>
    %cst_105 = arith.constant dense<0.000000e+00> : vector<8x8xf32>
    %157 = tpu.matmul %155, %156, %cst_105 {dimension_numbers = #tpu.dot_dimension_numbers<[1], [1], [0], [0], [0, 0, 1, 0], [], []>} : vector<8x16xbf16>, vector<8x16xbf16>, vector<8x8xf32> -> vector<8x8xf32>
    %cst_106 = arith.constant 2.500000e-01 : f32
    %158 = vector.broadcast %cst_106 : f32 to vector<8x8xf32>
    %159 = arith.mulf %157, %158 : vector<8x8xf32>
    %160 = vector.broadcast %129 : vector<1x8xf32> to vector<8x8xf32>
    %161 = arith.addf %159, %160 : vector<8x8xf32>
    %cst_107 = arith.constant dense<0xFF800000> : vector<8xf32>
    %162 = vector.multi_reduction <maximumf>, %161, %cst_107 [1] : vector<8x8xf32> to vector<8xf32>
    %163 = vector.shape_cast %162 : vector<8xf32> to vector<8x1xf32>
    %164 = vector.broadcast %163 : vector<8x1xf32> to vector<8x8xf32>
    %165 = arith.subf %161, %164 : vector<8x8xf32>
    %166 = math.exp %165 : vector<8x8xf32>
    %cst_108 = arith.constant dense<0.000000e+00> : vector<8xf32>
    %167 = vector.multi_reduction <add>, %166, %cst_108 [1] : vector<8x8xf32> to vector<8xf32>
    %168 = vector.shape_cast %167 : vector<8xf32> to vector<8x1xf32>
    %169 = tpu.reciprocal %168 {approx = true} : vector<8x1xf32> -> vector<8x1xf32>
    %170 = vector.broadcast %169 : vector<8x1xf32> to vector<8x8xf32>
    %171 = arith.mulf %166, %170 : vector<8x8xf32>
    %172 = arith.truncf %171 : vector<8x8xf32> to vector<8x8xbf16>
    %173 = arith.truncf %154 : vector<8x16xf32> to vector<8x16xbf16>
    %cst_109 = arith.constant dense<0.000000e+00> : vector<8x16xf32>
    %174 = tpu.matmul %172, %173, %cst_109 {dimension_numbers = #tpu.dot_dimension_numbers<[1], [0], [0], [1], [0, 0, 1, 1], [], []>} : vector<8x8xbf16>, vector<8x16xbf16>, vector<8x16xf32> -> vector<8x16xf32>
    %175 = vector.extract_strided_slice %151 {offsets = [0, 16], sizes = [8, 16], strides = [1, 1]} : vector<8x96xf32> to vector<8x16xf32>
    %176 = vector.extract_strided_slice %151 {offsets = [0, 48], sizes = [8, 16], strides = [1, 1]} : vector<8x96xf32> to vector<8x16xf32>
    %177 = vector.extract_strided_slice %151 {offsets = [0, 80], sizes = [8, 16], strides = [1, 1]} : vector<8x96xf32> to vector<8x16xf32>
    %178 = arith.truncf %175 : vector<8x16xf32> to vector<8x16xbf16>
    %179 = arith.truncf %176 : vector<8x16xf32> to vector<8x16xbf16>
    %cst_110 = arith.constant dense<0.000000e+00> : vector<8x8xf32>
    %180 = tpu.matmul %178, %179, %cst_110 {dimension_numbers = #tpu.dot_dimension_numbers<[1], [1], [0], [0], [0, 0, 1, 0], [], []>} : vector<8x16xbf16>, vector<8x16xbf16>, vector<8x8xf32> -> vector<8x8xf32>
    %cst_111 = arith.constant 2.500000e-01 : f32
    %181 = vector.broadcast %cst_111 : f32 to vector<8x8xf32>
    %182 = arith.mulf %180, %181 : vector<8x8xf32>
    %183 = vector.broadcast %129 : vector<1x8xf32> to vector<8x8xf32>
    %184 = arith.addf %182, %183 : vector<8x8xf32>
    %cst_112 = arith.constant dense<0xFF800000> : vector<8xf32>
    %185 = vector.multi_reduction <maximumf>, %184, %cst_112 [1] : vector<8x8xf32> to vector<8xf32>
    %186 = vector.shape_cast %185 : vector<8xf32> to vector<8x1xf32>
    %187 = vector.broadcast %186 : vector<8x1xf32> to vector<8x8xf32>
    %188 = arith.subf %184, %187 : vector<8x8xf32>
    %189 = math.exp %188 : vector<8x8xf32>
    %cst_113 = arith.constant dense<0.000000e+00> : vector<8xf32>
    %190 = vector.multi_reduction <add>, %189, %cst_113 [1] : vector<8x8xf32> to vector<8xf32>
    %191 = vector.shape_cast %190 : vector<8xf32> to vector<8x1xf32>
    %192 = tpu.reciprocal %191 {approx = true} : vector<8x1xf32> -> vector<8x1xf32>
    %193 = vector.broadcast %192 : vector<8x1xf32> to vector<8x8xf32>
    %194 = arith.mulf %189, %193 : vector<8x8xf32>
    %195 = arith.truncf %194 : vector<8x8xf32> to vector<8x8xbf16>
    %196 = arith.truncf %177 : vector<8x16xf32> to vector<8x16xbf16>
    %cst_114 = arith.constant dense<0.000000e+00> : vector<8x16xf32>
    %197 = tpu.matmul %195, %196, %cst_114 {dimension_numbers = #tpu.dot_dimension_numbers<[1], [0], [0], [1], [0, 0, 1, 1], [], []>} : vector<8x8xbf16>, vector<8x16xbf16>, vector<8x16xf32> -> vector<8x16xf32>
    %198 = tpu.concatenate %174, %197 in 1 : vector<8x16xf32>, vector<8x16xf32> -> vector<8x32xf32>
    %199 = arith.truncf %198 : vector<8x32xf32> to vector<8x32xbf16>
    %cst_115 = arith.constant dense<0.000000e+00> : vector<8x32xf32>
    %200 = tpu.matmul %199, %138, %cst_115 {dimension_numbers = #tpu.dot_dimension_numbers<[1], [0], [0], [1], [0, 0, 1, 1], [], []>} : vector<8x32xbf16>, vector<32x32xbf16>, vector<8x32xf32> -> vector<8x32xf32>
    %201 = vector.broadcast %142 : vector<1x32xf32> to vector<8x32xf32>
    %202 = arith.addf %200, %201 : vector<8x32xf32>
    %203 = arith.addf %122, %202 : vector<8x32xf32>
    %cst_116 = arith.constant dense<0.000000e+00> : vector<8xf32>
    %204 = vector.multi_reduction <add>, %203, %cst_116 [1] : vector<8x32xf32> to vector<8xf32>
    %205 = vector.shape_cast %204 : vector<8xf32> to vector<8x1xf32>
    %cst_117 = arith.constant 3.200000e+01 : f32
    %206 = vector.broadcast %cst_117 : f32 to vector<8x1xf32>
    %207 = arith.divf %205, %206 : vector<8x1xf32>
    %208 = vector.broadcast %207 : vector<8x1xf32> to vector<8x32xf32>
    %209 = arith.subf %203, %208 : vector<8x32xf32>
    %210 = arith.mulf %209, %209 : vector<8x32xf32>
    %cst_118 = arith.constant dense<0.000000e+00> : vector<8xf32>
    %211 = vector.multi_reduction <add>, %210, %cst_118 [1] : vector<8x32xf32> to vector<8xf32>
    %212 = vector.shape_cast %211 : vector<8xf32> to vector<8x1xf32>
    %cst_119 = arith.constant 3.200000e+01 : f32
    %213 = vector.broadcast %cst_119 : f32 to vector<8x1xf32>
    %214 = arith.divf %212, %213 : vector<8x1xf32>
    %215 = vector.broadcast %207 : vector<8x1xf32> to vector<8x32xf32>
    %216 = arith.subf %203, %215 : vector<8x32xf32>
    %cst_120 = arith.constant 9.99999996E-13 : f32
    %217 = vector.broadcast %cst_120 : f32 to vector<8x1xf32>
    %218 = arith.addf %214, %217 : vector<8x1xf32>
    %219 = math.rsqrt %218 : vector<8x1xf32>
    %220 = vector.broadcast %219 : vector<8x1xf32> to vector<8x32xf32>
    %221 = arith.mulf %216, %220 : vector<8x32xf32>
    %222 = vector.broadcast %143 : vector<1x32xf32> to vector<8x32xf32>
    %223 = arith.mulf %221, %222 : vector<8x32xf32>
    %224 = vector.broadcast %144 : vector<1x32xf32> to vector<8x32xf32>
    %225 = arith.addf %223, %224 : vector<8x32xf32>
    %226 = arith.truncf %225 : vector<8x32xf32> to vector<8x32xbf16>
    %227 = arith.index_cast %c0_i32_95 : i32 to index
    %c0_121 = arith.constant 0 : index
    %c0_122 = arith.constant 0 : index
    %228 = vector.load %arg10[%227, %c0_121, %c0_122] : memref<2x32x64xbf16, #tpu.memory_space<vmem>>, vector<1x32x64xbf16>
    %229 = vector.shape_cast %228 : vector<1x32x64xbf16> to vector<32x64xbf16>
    %cst_123 = arith.constant dense<0.000000e+00> : vector<8x64xf32>
    %230 = tpu.matmul %226, %229, %cst_123 {dimension_numbers = #tpu.dot_dimension_numbers<[1], [0], [0], [1], [0, 0, 1, 1], [], []>} : vector<8x32xbf16>, vector<32x64xbf16>, vector<8x64xf32> -> vector<8x64xf32>
    %231 = arith.index_cast %c0_i32_95 : i32 to index
    %c0_124 = arith.constant 0 : index
    %c0_125 = arith.constant 0 : index
    %232 = vector.load %arg11[%231, %c0_124, %c0_125] : memref<2x1x64xf32, #tpu.memory_space<vmem>>, vector<1x1x64xf32>
    %233 = vector.shape_cast %232 : vector<1x1x64xf32> to vector<1x64xf32>
    %234 = vector.broadcast %233 : vector<1x64xf32> to vector<8x64xf32>
    %235 = arith.addf %230, %234 : vector<8x64xf32>
    %236 = arith.mulf %235, %235 : vector<8x64xf32>
    %237 = arith.mulf %235, %236 : vector<8x64xf32>
    %cst_126 = arith.constant 4.471500e-02 : f32
    %238 = vector.broadcast %cst_126 : f32 to vector<8x64xf32>
    %239 = arith.mulf %238, %237 : vector<8x64xf32>
    %240 = arith.addf %235, %239 : vector<8x64xf32>
    %cst_127 = arith.constant 0.797884583 : f32
    %241 = vector.broadcast %cst_127 : f32 to vector<8x64xf32>
    %242 = arith.mulf %241, %240 : vector<8x64xf32>
    %243 = math.tanh %242 : vector<8x64xf32>
    %cst_128 = arith.constant 1.000000e+00 : f32
    %244 = vector.broadcast %cst_128 : f32 to vector<8x64xf32>
    %245 = arith.addf %244, %243 : vector<8x64xf32>
    %cst_129 = arith.constant 5.000000e-01 : f32
    %246 = vector.broadcast %cst_129 : f32 to vector<8x64xf32>
    %247 = arith.mulf %246, %245 : vector<8x64xf32>
    %248 = arith.mulf %235, %247 : vector<8x64xf32>
    %249 = arith.truncf %248 : vector<8x64xf32> to vector<8x64xbf16>
    %250 = arith.index_cast %c0_i32_95 : i32 to index
    %c0_130 = arith.constant 0 : index
    %c0_131 = arith.constant 0 : index
    %251 = vector.load %arg12[%250, %c0_130, %c0_131] : memref<2x64x32xbf16, #tpu.memory_space<vmem>>, vector<1x64x32xbf16>
    %252 = vector.shape_cast %251 : vector<1x64x32xbf16> to vector<64x32xbf16>
    %cst_132 = arith.constant dense<0.000000e+00> : vector<8x32xf32>
    %253 = tpu.matmul %249, %252, %cst_132 {dimension_numbers = #tpu.dot_dimension_numbers<[1], [0], [0], [1], [0, 0, 1, 1], [], []>} : vector<8x64xbf16>, vector<64x32xbf16>, vector<8x32xf32> -> vector<8x32xf32>
    %254 = vector.broadcast %145 : vector<1x32xf32> to vector<8x32xf32>
    %255 = arith.addf %253, %254 : vector<8x32xf32>
    %256 = arith.addf %225, %255 : vector<8x32xf32>
    %cst_133 = arith.constant dense<0.000000e+00> : vector<8xf32>
    %257 = vector.multi_reduction <add>, %256, %cst_133 [1] : vector<8x32xf32> to vector<8xf32>
    %258 = vector.shape_cast %257 : vector<8xf32> to vector<8x1xf32>
    %cst_134 = arith.constant 3.200000e+01 : f32
    %259 = vector.broadcast %cst_134 : f32 to vector<8x1xf32>
    %260 = arith.divf %258, %259 : vector<8x1xf32>
    %261 = vector.broadcast %260 : vector<8x1xf32> to vector<8x32xf32>
    %262 = arith.subf %256, %261 : vector<8x32xf32>
    %263 = arith.mulf %262, %262 : vector<8x32xf32>
    %cst_135 = arith.constant dense<0.000000e+00> : vector<8xf32>
    %264 = vector.multi_reduction <add>, %263, %cst_135 [1] : vector<8x32xf32> to vector<8xf32>
    %265 = vector.shape_cast %264 : vector<8xf32> to vector<8x1xf32>
    %cst_136 = arith.constant 3.200000e+01 : f32
    %266 = vector.broadcast %cst_136 : f32 to vector<8x1xf32>
    %267 = arith.divf %265, %266 : vector<8x1xf32>
    %268 = vector.broadcast %260 : vector<8x1xf32> to vector<8x32xf32>
    %269 = arith.subf %256, %268 : vector<8x32xf32>
    %cst_137 = arith.constant 9.99999996E-13 : f32
    %270 = vector.broadcast %cst_137 : f32 to vector<8x1xf32>
    %271 = arith.addf %267, %270 : vector<8x1xf32>
    %272 = math.rsqrt %271 : vector<8x1xf32>
    %273 = vector.broadcast %272 : vector<8x1xf32> to vector<8x32xf32>
    %274 = arith.mulf %269, %273 : vector<8x32xf32>
    %275 = vector.broadcast %146 : vector<1x32xf32> to vector<8x32xf32>
    %276 = arith.mulf %274, %275 : vector<8x32xf32>
    %277 = vector.broadcast %147 : vector<1x32xf32> to vector<8x32xf32>
    %278 = arith.addf %276, %277 : vector<8x32xf32>
    %c1_i32_138 = arith.constant 1 : i32
    %279 = arith.index_cast %c1_i32_138 : i32 to index
    %c0_139 = arith.constant 0 : index
    %c0_140 = arith.constant 0 : index
    %280 = vector.load %arg6[%279, %c0_139, %c0_140] : memref<2x32x96xbf16, #tpu.memory_space<vmem>>, vector<1x32x96xbf16>
    %281 = vector.shape_cast %280 : vector<1x32x96xbf16> to vector<32x96xbf16>
    %282 = arith.index_cast %c1_i32_138 : i32 to index
    %c0_141 = arith.constant 0 : index
    %c0_142 = arith.constant 0 : index
    %283 = vector.load %arg7[%282, %c0_141, %c0_142] : memref<2x1x96xf32, #tpu.memory_space<vmem>>, vector<1x1x96xf32>
    %284 = vector.shape_cast %283 : vector<1x1x96xf32> to vector<1x96xf32>
    %285 = arith.index_cast %c1_i32_138 : i32 to index
    %c0_143 = arith.constant 0 : index
    %c0_144 = arith.constant 0 : index
    %286 = vector.load %arg8[%285, %c0_143, %c0_144] : memref<2x32x32xbf16, #tpu.memory_space<vmem>>, vector<1x32x32xbf16>
    %287 = vector.shape_cast %286 : vector<1x32x32xbf16> to vector<32x32xbf16>
    %288 = arith.index_cast %c1_i32_138 : i32 to index
    %c0_145 = arith.constant 0 : index
    %c0_146 = arith.constant 0 : index
    %289 = vector.load %arg9[%288, %c0_145, %c0_146] : memref<2x6x32xf32, #tpu.memory_space<vmem>>, vector<1x6x32xf32>
    %290 = vector.shape_cast %289 : vector<1x6x32xf32> to vector<6x32xf32>
    %291 = vector.extract_strided_slice %290 {offsets = [0, 0], sizes = [1, 32], strides = [1, 1]} : vector<6x32xf32> to vector<1x32xf32>
    %292 = vector.extract_strided_slice %290 {offsets = [1, 0], sizes = [1, 32], strides = [1, 1]} : vector<6x32xf32> to vector<1x32xf32>
    %293 = vector.extract_strided_slice %290 {offsets = [2, 0], sizes = [1, 32], strides = [1, 1]} : vector<6x32xf32> to vector<1x32xf32>
    %294 = vector.extract_strided_slice %290 {offsets = [3, 0], sizes = [1, 32], strides = [1, 1]} : vector<6x32xf32> to vector<1x32xf32>
    %295 = vector.extract_strided_slice %290 {offsets = [4, 0], sizes = [1, 32], strides = [1, 1]} : vector<6x32xf32> to vector<1x32xf32>
    %296 = vector.extract_strided_slice %290 {offsets = [5, 0], sizes = [1, 32], strides = [1, 1]} : vector<6x32xf32> to vector<1x32xf32>
    %297 = arith.truncf %278 : vector<8x32xf32> to vector<8x32xbf16>
    %cst_147 = arith.constant dense<0.000000e+00> : vector<8x96xf32>
    %298 = tpu.matmul %297, %281, %cst_147 {dimension_numbers = #tpu.dot_dimension_numbers<[1], [0], [0], [1], [0, 0, 1, 1], [], []>} : vector<8x32xbf16>, vector<32x96xbf16>, vector<8x96xf32> -> vector<8x96xf32>
    %299 = vector.broadcast %284 : vector<1x96xf32> to vector<8x96xf32>
    %300 = arith.addf %298, %299 : vector<8x96xf32>
    %301 = vector.extract_strided_slice %300 {offsets = [0, 0], sizes = [8, 16], strides = [1, 1]} : vector<8x96xf32> to vector<8x16xf32>
    %302 = vector.extract_strided_slice %300 {offsets = [0, 32], sizes = [8, 16], strides = [1, 1]} : vector<8x96xf32> to vector<8x16xf32>
    %303 = vector.extract_strided_slice %300 {offsets = [0, 64], sizes = [8, 16], strides = [1, 1]} : vector<8x96xf32> to vector<8x16xf32>
    %304 = arith.truncf %301 : vector<8x16xf32> to vector<8x16xbf16>
    %305 = arith.truncf %302 : vector<8x16xf32> to vector<8x16xbf16>
    %cst_148 = arith.constant dense<0.000000e+00> : vector<8x8xf32>
    %306 = tpu.matmul %304, %305, %cst_148 {dimension_numbers = #tpu.dot_dimension_numbers<[1], [1], [0], [0], [0, 0, 1, 0], [], []>} : vector<8x16xbf16>, vector<8x16xbf16>, vector<8x8xf32> -> vector<8x8xf32>
    %cst_149 = arith.constant 2.500000e-01 : f32
    %307 = vector.broadcast %cst_149 : f32 to vector<8x8xf32>
    %308 = arith.mulf %306, %307 : vector<8x8xf32>
    %309 = vector.broadcast %129 : vector<1x8xf32> to vector<8x8xf32>
    %310 = arith.addf %308, %309 : vector<8x8xf32>
    %cst_150 = arith.constant dense<0xFF800000> : vector<8xf32>
    %311 = vector.multi_reduction <maximumf>, %310, %cst_150 [1] : vector<8x8xf32> to vector<8xf32>
    %312 = vector.shape_cast %311 : vector<8xf32> to vector<8x1xf32>
    %313 = vector.broadcast %312 : vector<8x1xf32> to vector<8x8xf32>
    %314 = arith.subf %310, %313 : vector<8x8xf32>
    %315 = math.exp %314 : vector<8x8xf32>
    %cst_151 = arith.constant dense<0.000000e+00> : vector<8xf32>
    %316 = vector.multi_reduction <add>, %315, %cst_151 [1] : vector<8x8xf32> to vector<8xf32>
    %317 = vector.shape_cast %316 : vector<8xf32> to vector<8x1xf32>
    %318 = tpu.reciprocal %317 {approx = true} : vector<8x1xf32> -> vector<8x1xf32>
    %319 = vector.broadcast %318 : vector<8x1xf32> to vector<8x8xf32>
    %320 = arith.mulf %315, %319 : vector<8x8xf32>
    %321 = arith.truncf %320 : vector<8x8xf32> to vector<8x8xbf16>
    %322 = arith.truncf %303 : vector<8x16xf32> to vector<8x16xbf16>
    %cst_152 = arith.constant dense<0.000000e+00> : vector<8x16xf32>
    %323 = tpu.matmul %321, %322, %cst_152 {dimension_numbers = #tpu.dot_dimension_numbers<[1], [0], [0], [1], [0, 0, 1, 1], [], []>} : vector<8x8xbf16>, vector<8x16xbf16>, vector<8x16xf32> -> vector<8x16xf32>
    %324 = vector.extract_strided_slice %300 {offsets = [0, 16], sizes = [8, 16], strides = [1, 1]} : vector<8x96xf32> to vector<8x16xf32>
    %325 = vector.extract_strided_slice %300 {offsets = [0, 48], sizes = [8, 16], strides = [1, 1]} : vector<8x96xf32> to vector<8x16xf32>
    %326 = vector.extract_strided_slice %300 {offsets = [0, 80], sizes = [8, 16], strides = [1, 1]} : vector<8x96xf32> to vector<8x16xf32>
    %327 = arith.truncf %324 : vector<8x16xf32> to vector<8x16xbf16>
    %328 = arith.truncf %325 : vector<8x16xf32> to vector<8x16xbf16>
    %cst_153 = arith.constant dense<0.000000e+00> : vector<8x8xf32>
    %329 = tpu.matmul %327, %328, %cst_153 {dimension_numbers = #tpu.dot_dimension_numbers<[1], [1], [0], [0], [0, 0, 1, 0], [], []>} : vector<8x16xbf16>, vector<8x16xbf16>, vector<8x8xf32> -> vector<8x8xf32>
    %cst_154 = arith.constant 2.500000e-01 : f32
    %330 = vector.broadcast %cst_154 : f32 to vector<8x8xf32>
    %331 = arith.mulf %329, %330 : vector<8x8xf32>
    %332 = vector.broadcast %129 : vector<1x8xf32> to vector<8x8xf32>
    %333 = arith.addf %331, %332 : vector<8x8xf32>
    %cst_155 = arith.constant dense<0xFF800000> : vector<8xf32>
    %334 = vector.multi_reduction <maximumf>, %333, %cst_155 [1] : vector<8x8xf32> to vector<8xf32>
    %335 = vector.shape_cast %334 : vector<8xf32> to vector<8x1xf32>
    %336 = vector.broadcast %335 : vector<8x1xf32> to vector<8x8xf32>
    %337 = arith.subf %333, %336 : vector<8x8xf32>
    %338 = math.exp %337 : vector<8x8xf32>
    %cst_156 = arith.constant dense<0.000000e+00> : vector<8xf32>
    %339 = vector.multi_reduction <add>, %338, %cst_156 [1] : vector<8x8xf32> to vector<8xf32>
    %340 = vector.shape_cast %339 : vector<8xf32> to vector<8x1xf32>
    %341 = tpu.reciprocal %340 {approx = true} : vector<8x1xf32> -> vector<8x1xf32>
    %342 = vector.broadcast %341 : vector<8x1xf32> to vector<8x8xf32>
    %343 = arith.mulf %338, %342 : vector<8x8xf32>
    %344 = arith.truncf %343 : vector<8x8xf32> to vector<8x8xbf16>
    %345 = arith.truncf %326 : vector<8x16xf32> to vector<8x16xbf16>
    %cst_157 = arith.constant dense<0.000000e+00> : vector<8x16xf32>
    %346 = tpu.matmul %344, %345, %cst_157 {dimension_numbers = #tpu.dot_dimension_numbers<[1], [0], [0], [1], [0, 0, 1, 1], [], []>} : vector<8x8xbf16>, vector<8x16xbf16>, vector<8x16xf32> -> vector<8x16xf32>
    %347 = tpu.concatenate %323, %346 in 1 : vector<8x16xf32>, vector<8x16xf32> -> vector<8x32xf32>
    %348 = arith.truncf %347 : vector<8x32xf32> to vector<8x32xbf16>
    %cst_158 = arith.constant dense<0.000000e+00> : vector<8x32xf32>
    %349 = tpu.matmul %348, %287, %cst_158 {dimension_numbers = #tpu.dot_dimension_numbers<[1], [0], [0], [1], [0, 0, 1, 1], [], []>} : vector<8x32xbf16>, vector<32x32xbf16>, vector<8x32xf32> -> vector<8x32xf32>
    %350 = vector.broadcast %291 : vector<1x32xf32> to vector<8x32xf32>
    %351 = arith.addf %349, %350 : vector<8x32xf32>
    %352 = arith.addf %278, %351 : vector<8x32xf32>
    %cst_159 = arith.constant dense<0.000000e+00> : vector<8xf32>
    %353 = vector.multi_reduction <add>, %352, %cst_159 [1] : vector<8x32xf32> to vector<8xf32>
    %354 = vector.shape_cast %353 : vector<8xf32> to vector<8x1xf32>
    %cst_160 = arith.constant 3.200000e+01 : f32
    %355 = vector.broadcast %cst_160 : f32 to vector<8x1xf32>
    %356 = arith.divf %354, %355 : vector<8x1xf32>
    %357 = vector.broadcast %356 : vector<8x1xf32> to vector<8x32xf32>
    %358 = arith.subf %352, %357 : vector<8x32xf32>
    %359 = arith.mulf %358, %358 : vector<8x32xf32>
    %cst_161 = arith.constant dense<0.000000e+00> : vector<8xf32>
    %360 = vector.multi_reduction <add>, %359, %cst_161 [1] : vector<8x32xf32> to vector<8xf32>
    %361 = vector.shape_cast %360 : vector<8xf32> to vector<8x1xf32>
    %cst_162 = arith.constant 3.200000e+01 : f32
    %362 = vector.broadcast %cst_162 : f32 to vector<8x1xf32>
    %363 = arith.divf %361, %362 : vector<8x1xf32>
    %364 = vector.broadcast %356 : vector<8x1xf32> to vector<8x32xf32>
    %365 = arith.subf %352, %364 : vector<8x32xf32>
    %cst_163 = arith.constant 9.99999996E-13 : f32
    %366 = vector.broadcast %cst_163 : f32 to vector<8x1xf32>
    %367 = arith.addf %363, %366 : vector<8x1xf32>
    %368 = math.rsqrt %367 : vector<8x1xf32>
    %369 = vector.broadcast %368 : vector<8x1xf32> to vector<8x32xf32>
    %370 = arith.mulf %365, %369 : vector<8x32xf32>
    %371 = vector.broadcast %292 : vector<1x32xf32> to vector<8x32xf32>
    %372 = arith.mulf %370, %371 : vector<8x32xf32>
    %373 = vector.broadcast %293 : vector<1x32xf32> to vector<8x32xf32>
    %374 = arith.addf %372, %373 : vector<8x32xf32>
    %375 = arith.truncf %374 : vector<8x32xf32> to vector<8x32xbf16>
    %376 = arith.index_cast %c1_i32_138 : i32 to index
    %c0_164 = arith.constant 0 : index
    %c0_165 = arith.constant 0 : index
    %377 = vector.load %arg10[%376, %c0_164, %c0_165] : memref<2x32x64xbf16, #tpu.memory_space<vmem>>, vector<1x32x64xbf16>
    %378 = vector.shape_cast %377 : vector<1x32x64xbf16> to vector<32x64xbf16>
    %cst_166 = arith.constant dense<0.000000e+00> : vector<8x64xf32>
    %379 = tpu.matmul %375, %378, %cst_166 {dimension_numbers = #tpu.dot_dimension_numbers<[1], [0], [0], [1], [0, 0, 1, 1], [], []>} : vector<8x32xbf16>, vector<32x64xbf16>, vector<8x64xf32> -> vector<8x64xf32>
    %380 = arith.index_cast %c1_i32_138 : i32 to index
    %c0_167 = arith.constant 0 : index
    %c0_168 = arith.constant 0 : index
    %381 = vector.load %arg11[%380, %c0_167, %c0_168] : memref<2x1x64xf32, #tpu.memory_space<vmem>>, vector<1x1x64xf32>
    %382 = vector.shape_cast %381 : vector<1x1x64xf32> to vector<1x64xf32>
    %383 = vector.broadcast %382 : vector<1x64xf32> to vector<8x64xf32>
    %384 = arith.addf %379, %383 : vector<8x64xf32>
    %385 = arith.mulf %384, %384 : vector<8x64xf32>
    %386 = arith.mulf %384, %385 : vector<8x64xf32>
    %cst_169 = arith.constant 4.471500e-02 : f32
    %387 = vector.broadcast %cst_169 : f32 to vector<8x64xf32>
    %388 = arith.mulf %387, %386 : vector<8x64xf32>
    %389 = arith.addf %384, %388 : vector<8x64xf32>
    %cst_170 = arith.constant 0.797884583 : f32
    %390 = vector.broadcast %cst_170 : f32 to vector<8x64xf32>
    %391 = arith.mulf %390, %389 : vector<8x64xf32>
    %392 = math.tanh %391 : vector<8x64xf32>
    %cst_171 = arith.constant 1.000000e+00 : f32
    %393 = vector.broadcast %cst_171 : f32 to vector<8x64xf32>
    %394 = arith.addf %393, %392 : vector<8x64xf32>
    %cst_172 = arith.constant 5.000000e-01 : f32
    %395 = vector.broadcast %cst_172 : f32 to vector<8x64xf32>
    %396 = arith.mulf %395, %394 : vector<8x64xf32>
    %397 = arith.mulf %384, %396 : vector<8x64xf32>
    %398 = arith.truncf %397 : vector<8x64xf32> to vector<8x64xbf16>
    %399 = arith.index_cast %c1_i32_138 : i32 to index
    %c0_173 = arith.constant 0 : index
    %c0_174 = arith.constant 0 : index
    %400 = vector.load %arg12[%399, %c0_173, %c0_174] : memref<2x64x32xbf16, #tpu.memory_space<vmem>>, vector<1x64x32xbf16>
    %401 = vector.shape_cast %400 : vector<1x64x32xbf16> to vector<64x32xbf16>
    %cst_175 = arith.constant dense<0.000000e+00> : vector<8x32xf32>
    %402 = tpu.matmul %398, %401, %cst_175 {dimension_numbers = #tpu.dot_dimension_numbers<[1], [0], [0], [1], [0, 0, 1, 1], [], []>} : vector<8x64xbf16>, vector<64x32xbf16>, vector<8x32xf32> -> vector<8x32xf32>
    %403 = vector.broadcast %294 : vector<1x32xf32> to vector<8x32xf32>
    %404 = arith.addf %402, %403 : vector<8x32xf32>
    %405 = arith.addf %374, %404 : vector<8x32xf32>
    %cst_176 = arith.constant dense<0.000000e+00> : vector<8xf32>
    %406 = vector.multi_reduction <add>, %405, %cst_176 [1] : vector<8x32xf32> to vector<8xf32>
    %407 = vector.shape_cast %406 : vector<8xf32> to vector<8x1xf32>
    %cst_177 = arith.constant 3.200000e+01 : f32
    %408 = vector.broadcast %cst_177 : f32 to vector<8x1xf32>
    %409 = arith.divf %407, %408 : vector<8x1xf32>
    %410 = vector.broadcast %409 : vector<8x1xf32> to vector<8x32xf32>
    %411 = arith.subf %405, %410 : vector<8x32xf32>
    %412 = arith.mulf %411, %411 : vector<8x32xf32>
    %cst_178 = arith.constant dense<0.000000e+00> : vector<8xf32>
    %413 = vector.multi_reduction <add>, %412, %cst_178 [1] : vector<8x32xf32> to vector<8xf32>
    %414 = vector.shape_cast %413 : vector<8xf32> to vector<8x1xf32>
    %cst_179 = arith.constant 3.200000e+01 : f32
    %415 = vector.broadcast %cst_179 : f32 to vector<8x1xf32>
    %416 = arith.divf %414, %415 : vector<8x1xf32>
    %417 = vector.broadcast %409 : vector<8x1xf32> to vector<8x32xf32>
    %418 = arith.subf %405, %417 : vector<8x32xf32>
    %cst_180 = arith.constant 9.99999996E-13 : f32
    %419 = vector.broadcast %cst_180 : f32 to vector<8x1xf32>
    %420 = arith.addf %416, %419 : vector<8x1xf32>
    %421 = math.rsqrt %420 : vector<8x1xf32>
    %422 = vector.broadcast %421 : vector<8x1xf32> to vector<8x32xf32>
    %423 = arith.mulf %418, %422 : vector<8x32xf32>
    %424 = vector.broadcast %295 : vector<1x32xf32> to vector<8x32xf32>
    %425 = arith.mulf %423, %424 : vector<8x32xf32>
    %426 = vector.broadcast %296 : vector<1x32xf32> to vector<8x32xf32>
    %427 = arith.addf %425, %426 : vector<8x32xf32>
    %c2_i32_181 = arith.constant 2 : i32
    %cst_182 = arith.constant dense<0.000000e+00> : vector<1x32xf32>
    %428 = tpu.matmul %124, %427, %cst_182 {dimension_numbers = #tpu.dot_dimension_numbers<[1], [0], [0], [1], [0, 0, 1, 1], [], []>} : vector<1x8xf32>, vector<8x32xf32>, vector<1x32xf32> -> vector<1x32xf32>
    %cst_183 = arith.constant dense<0.000000e+00> : vector<1xf32>
    %429 = vector.multi_reduction <add>, %124, %cst_183 [1] : vector<1x8xf32> to vector<1xf32>
    %430 = vector.shape_cast %429 : vector<1xf32> to vector<1x1xf32>
    %cst_184 = arith.constant 9.99999971E-10 : f32
    %431 = vector.broadcast %cst_184 : f32 to vector<1x1xf32>
    %432 = arith.maximumf %430, %431 : vector<1x1xf32>
    %433 = vector.broadcast %432 : vector<1x1xf32> to vector<1x32xf32>
    %434 = arith.divf %428, %433 : vector<1x32xf32>
    %435 = arith.truncf %434 : vector<1x32xf32> to vector<1x32xbf16>
    %c0_185 = arith.constant 0 : index
    %c0_186 = arith.constant 0 : index
    %436 = vector.load %arg5[%c0_185, %c0_186] : memref<32x16xbf16, #tpu.memory_space<vmem>>, vector<32x16xbf16>
    %cst_187 = arith.constant dense<0.000000e+00> : vector<1x16xf32>
    %437 = tpu.matmul %435, %436, %cst_187 {dimension_numbers = #tpu.dot_dimension_numbers<[1], [0], [0], [1], [0, 0, 1, 1], [], []>} : vector<1x32xbf16>, vector<32x16xbf16>, vector<1x16xf32> -> vector<1x16xf32>
    %438 = vector.shape_cast %437 : vector<1x16xf32> to vector<1x1x16xf32>
    %c0_188 = arith.constant 0 : index
    %c0_189 = arith.constant 0 : index
    %c0_190 = arith.constant 0 : index
    %439 = vector.load %arg14[%c0_188, %c0_189, %c0_190] : memref<1x1x16xf32, #tpu.memory_space<vmem>>, vector<1x1x16xf32>
    tpu.vector_store %arg14[%c0_188, %c0_189, %c0_190], %438 {strides = array<i32>} : memref<1x1x16xf32, #tpu.memory_space<vmem>>, vector<1x1x16xf32>,
    return
  }
  func.func @transform_0(%arg0: i32, %arg1: memref<16xi32, #tpu.memory_space<smem>>) -> (i32, i32, i32) {
    %c0_i32 = arith.constant 0 : i32
    %c0_i32_0 = arith.constant 0 : i32
    %c0_i32_1 = arith.constant 0 : i32
    return %arg0, %c0_i32, %c0_i32_0 : i32, i32, i32
  }
  func.func @transform_1(%arg0: i32, %arg1: memref<16xi32, #tpu.memory_space<smem>>) -> (i32, i32) {
    %c0_i32 = arith.constant 0 : i32
    %c0_i32_0 = arith.constant 0 : i32
    %c0_i32_1 = arith.constant 0 : i32
    return %c0_i32, %c0_i32_0 : i32, i32
  }
  func.func @transform_2(%arg0: i32, %arg1: memref<16xi32, #tpu.memory_space<smem>>) -> (i32, i32) {
    %c0_i32 = arith.constant 0 : i32
    %c0_i32_0 = arith.constant 0 : i32
    %c0_i32_1 = arith.constant 0 : i32
    return %c0_i32, %c0_i32_0 : i32, i32
  }
  func.func @transform_3(%arg0: i32, %arg1: memref<16xi32, #tpu.memory_space<smem>>) -> (i32, i32) {
    %c0_i32 = arith.constant 0 : i32
    %c0_i32_0 = arith.constant 0 : i32
    %c0_i32_1 = arith.constant 0 : i32
    return %c0_i32, %c0_i32_0 : i32, i32
  }
  func.func @transform_4(%arg0: i32, %arg1: memref<16xi32, #tpu.memory_space<smem>>) -> (i32, i32, i32) {
    %c0_i32 = arith.constant 0 : i32
    %c0_i32_0 = arith.constant 0 : i32
    %c0_i32_1 = arith.constant 0 : i32
    %c0_i32_2 = arith.constant 0 : i32
    return %c0_i32, %c0_i32_0, %c0_i32_1 : i32, i32, i32
  }
  func.func @transform_5(%arg0: i32, %arg1: memref<16xi32, #tpu.memory_space<smem>>) -> (i32, i32, i32) {
    %c0_i32 = arith.constant 0 : i32
    %c0_i32_0 = arith.constant 0 : i32
    %c0_i32_1 = arith.constant 0 : i32
    %c0_i32_2 = arith.constant 0 : i32
    return %c0_i32, %c0_i32_0, %c0_i32_1 : i32, i32, i32
  }
  func.func @transform_6(%arg0: i32, %arg1: memref<16xi32, #tpu.memory_space<smem>>) -> (i32, i32, i32) {
    %c0_i32 = arith.constant 0 : i32
    %c0_i32_0 = arith.constant 0 : i32
    %c0_i32_1 = arith.constant 0 : i32
    %c0_i32_2 = arith.constant 0 : i32
    return %c0_i32, %c0_i32_0, %c0_i32_1 : i32, i32, i32
  }
  func.func @transform_7(%arg0: i32, %arg1: memref<16xi32, #tpu.memory_space<smem>>) -> (i32, i32, i32) {
    %c0_i32 = arith.constant 0 : i32
    %c0_i32_0 = arith.constant 0 : i32
    %c0_i32_1 = arith.constant 0 : i32
    %c0_i32_2 = arith.constant 0 : i32
    return %c0_i32, %c0_i32_0, %c0_i32_1 : i32, i32, i32
  }
  func.func @transform_8(%arg0: i32, %arg1: memref<16xi32, #tpu.memory_space<smem>>) -> (i32, i32, i32) {
    %c0_i32 = arith.constant 0 : i32
    %c0_i32_0 = arith.constant 0 : i32
    %c0_i32_1 = arith.constant 0 : i32
    %c0_i32_2 = arith.constant 0 : i32
    return %c0_i32, %c0_i32_0, %c0_i32_1 : i32, i32, i32
  }
  func.func @transform_9(%arg0: i32, %arg1: memref<16xi32, #tpu.memory_space<smem>>) -> (i32, i32, i32) {
    %c0_i32 = arith.constant 0 : i32
    %c0_i32_0 = arith.constant 0 : i32
    %c0_i32_1 = arith.constant 0 : i32
    %c0_i32_2 = arith.constant 0 : i32
    return %c0_i32, %c0_i32_0, %c0_i32_1 : i32, i32, i32
  }
  func.func @transform_10(%arg0: i32, %arg1: memref<16xi32, #tpu.memory_space<smem>>) -> (i32, i32, i32) {
    %c0_i32 = arith.constant 0 : i32
    %c0_i32_0 = arith.constant 0 : i32
    %c0_i32_1 = arith.constant 0 : i32
    %c0_i32_2 = arith.constant 0 : i32
    return %c0_i32, %c0_i32_0, %c0_i32_1 : i32, i32, i32
  }
  func.func @transform_12(%arg0: i32, %arg1: memref<16xi32, #tpu.memory_space<smem>>) -> (i32, i32, i32) {
    %c0_i32 = arith.constant 0 : i32
    %c0_i32_0 = arith.constant 0 : i32
    %c0_i32_1 = arith.constant 0 : i32
    return %arg0, %c0_i32, %c0_i32_0 : i32, i32, i32
  }
}

</mosaic_0001>

<bundles_post_ra>
// kernel: tpu_custom_call.1
= control target key start
LH: loop header
LB: loop body
LE: loop exit
PB: predicated region body
PF: predicated region fallthrough
CT: control target
= control target key end

     0   :  { %s3339_s0 = inlined_call_operand.vmem [shape: s32[16], index: 0, kind: input, shape index: {}]   ;;  %s3340_s1 = inlined_call_operand.vmem [shape: f32[2,1,8], index: 1, kind: input, shape index: {}]   ;;  %s3341_s2 = inlined_call_operand.vmem [shape: f32[16,32], index: 2, kind: input, shape index: {}]   ;;  %s3342_s3 = inlined_call_operand.vmem [shape: f32[2,32], index: 3, kind: input, shape index: {}]   ;;  %s3343_s4 = inlined_call_operand.vmem [shape: bf16[32,16], index: 4, kind: input, shape index: {}]   ;;  %s3344_s5 = inlined_call_operand.vmem [shape: bf16[2,32,96], index: 5, kind: input, shape index: {}]   ;;  %s3345_s6 = inlined_call_operand.vmem [shape: f32[2,1,96], index: 6, kind: input, shape index: {}]   ;;  %s3346_s7 = inlined_call_operand.vmem [shape: bf16[2,32,32], index: 7, kind: input, shape index: {}]   ;;  %s3347_s8 = inlined_call_operand.vmem [shape: f32[2,6,32], index: 8, kind: input, shape index: {}]   ;;  %s3348_s9 = inlined_call_operand.vmem [shape: bf16[2,32,64], index: 9, kind: input, shape index: {}]   ;;  %s3349_s10 = inlined_call_operand.vmem [shape: f32[2,1,64], index: 10, kind: input, shape index: {}]   ;;  %s3350_s11 = inlined_call_operand.vmem [shape: bf16[2,64,32], index: 11, kind: input, shape index: {}]   ;;  %s3351_s12 = inlined_call_operand.vmem [shape: f32[64,32], index: 12, kind: input, shape index: {}]   ;;  %s3352_s13 = inlined_call_operand.hbm [shape: f32[2,1,16], index: 13, kind: output, shape index: {}]  }
   0x1   :  { %3361 = sst [smem:[#allocation32_spill]] %s3352_s13  ;;  %s18_s27 = sshll.u32 %s3339_s0, 4  ;;  %s19_s27 = int_to_ptr.vmem [resolvable:$true] %s18_s27 }
   0x2   :  { %s2717_s28 = scalar_lea.vmem %s19_s27, 16  ;;  %p2722_p1 = scmp.lt.s32.totalorder %s19_s27, %s19_s27 }
   0x3   :  { %p2718_p0 = scmp.ne.s32.totalorder %s19_s27, %s2717_s28  ;;  %p2723_p2 = scmp.lt.s32.totalorder %s2717_s28, %s2717_s28 }
   0x5   :  { %p2724_p3 = por %p2723_p2, %p2722_p1 }
   0x7   :  { %p2725_p4 = pnand %p2724_p3, %p2718_p0 }
   0x9   :  { %2728 = shalt.err (!%p2725_p4)  }
   0xa   :  { %s2809_s29 = smov [#allocation5]  }
   0xb   :  { %21 = dma.vmem_to_smem %s19_s27, 16, %s2809_s29, [#allocation4] }
   0xc   :  { %2771 = dma.done.wait [#allocation4], 16 }
   0xd   :  { %2772 = vsyncadd [#allocation4], 4294967280 }
   0xe   :  { %23 = sfence }
   0xf   :  { %24 = vsyncpa [#allocation7], 0 }
  0x10   :  { %26 = vsyncpa [#allocation7 + $0x1], 0  ;;  %s2893_s30 = smov 0   ;;  %s2895_s14 = smov 0  }
  0x11   :  { %s2897_s0 = smov 0   ;;  %s2899_s15 = smov 0  }
  0x12 LB: > { %3362 = sst [smem:[#allocation26_spill]] %s2795_s30  ;;  %s2914_s16 = sadd.s32 4294967295, %s2807_s15   ;;  %s2807_s15 = sphi %s2899_s15, %s3376_s15   ;;  %s2803_s0 = sphi %s2897_s0, %s3378_s0   ;;  %s2799_s14 = sphi %s2895_s14, %s3380_s14   ;;  %s2795_s30 = sphi %s2893_s30, %s3379_s30  }
  0x13   : > { %3363 = sst [smem:[#allocation27_spill]] %s2803_s0  ;;  %s2347_s17 = sadd.s32 4294967294, %s2807_s15  }
  0x14   : > { %3364 = sst [smem:[#allocation28_spill]] %s2807_s15  ;;  %s2918_s18 = sadd.s32 1, %s2807_s15  }
  0x15   : > { %3365 = sst [smem:[#allocation29_spill]] %s2918_s18  ;;  %s275_s19 = sadd.s32 1, %s2803_s0 }
  0x16   : > { %s272_s20 = ssub.s32 %s2807_s15, %s2918_s18  ;;  %p285_p5 = scmp.ne.s32.totalorder %s2803_s0, %s2799_s14 }
  0x17   : > { %p273_p6 = scmp.eq.s32.totalorder %s272_s20, 0  ;;  %p286_p7 = scmp.eq.s32.totalorder %s2914_s16, 1 }
  0x18   : > { %p291_p8 = scmp.ne.s32.totalorder %s2799_s14, %s2795_s30  ;;  %p292_p9 = scmp.eq.s32.totalorder %s2347_s17, 1 }
  0x19   : > { %s2929_s21 = scalar_select %p273_p6, %s2803_s0, %s275_s19  }
  0x1a   : > { %p2931_p10 = por %p286_p7, %p285_p5  ;;  %p2935_p11 = por %p292_p9, %p291_p8 }
  0x1b   : > { %3366 = sst [smem:[#allocation30_spill]] %s2929_s21  ;;  %p2350_p12 = scmp.ge.s32.totalorder %s2807_s15, 1 }
  0x1c   : > { %s3368_s23 = scalar_select %p2935_p11, 1, 0 }
  0x1d   : > { %p346_p13 = scmp.lt.s32.totalorder %s2807_s15, 3 }
  0x1e   : > { %3369 = sst [smem:[#allocation31_spill]] %s3368_s23 }
  0x1f   : > { %p347_p0 = pnand %p2350_p12, %p346_p13 }
  0x20   : > { %s3360_s24 = sand.u32 (!%p347_p0), 1, %s2799_s14   ;;  %p383_p1 = scmp.lt.s32.totalorder (!%p347_p0), %s2914_s16, 1 }
  0x21   : > { %350 = sbr.rel (%p347_p0) target bundleno = 5630 (0x15fe), region = 64  ;;  %s2944_s25 = sshll.u32 (!%p347_p0), %s2914_s16, 3 }
  0x22   : > { %s388_s27 = sld [smem:[#allocation5 + %s2944_s25]] (!%p347_p0)  ;;  %s2959_s0 = scalar_lea.vmem (!%p347_p0), [#allocation6], %s3360_s24 }
  0x26   : > { %s2947_s26 = scalar_select %p383_p1, %s2914_s16, 1 }
  0x28   : > { %s389_s21 = scalar_lea.vmem %s3351_s12, %s388_s27 }
  0x29   : > { %v408_v0 = vld [vmem:[%s389_s21] sm:$0x1] }
  0x2a   : > { %409 = vst [vmem:[#allocation2] sm:$0x1] %v408_v0 }
  0x2b   : > { %435 = vsyncadd [#allocation3], 16  ;;  %s436_s18 = sadd.s32 1, %s2944_s25 }
  0x2c   : > { %s437_s23 = sld [smem:[#allocation5 + %s436_s18]] }
  0x32   : > { %s438_s13 = scalar_lea.vmem %s3351_s12, %s437_s23 }
  0x33   : > { %v459_v1 = vld [vmem:[%s438_s13] sm:$0x1] }
  0x34   : > { %460 = vst [vmem:[#allocation2 + $0x1] sm:$0x1] %v459_v1 }
  0x35   : > { %486 = vsyncadd [#allocation3 + $0x1], 16  ;;  %s487_s28 = sadd.s32 2, %s2944_s25 }
  0x36   : > { %s488_s29 = sld [smem:[#allocation5 + %s487_s28]] }
  0x3c   : > { %s489_s19 = scalar_lea.vmem %s3351_s12, %s488_s29 }
  0x3d   : > { %v510_v2 = vld [vmem:[%s489_s19] sm:$0x1] }
  0x3e   : > { %511 = vst [vmem:[#allocation2 + $0x2] sm:$0x1] %v510_v2 }
  0x3f   : > { %537 = vsyncadd [#allocation3 + $0x2], 16  ;;  %s538_s20 = sadd.s32 3, %s2944_s25 }
  0x40   : > { %s539_s18 = sld [smem:[#allocation5 + %s538_s20]] }
  0x46   : > { %s540_s30 = scalar_lea.vmem %s3351_s12, %s539_s18 }
  0x47   : > { %v561_v3 = vld [vmem:[%s540_s30] sm:$0x1] }
  0x48   : > { %562 = vst [vmem:[#allocation2 + $0x3] sm:$0x1] %v561_v3 }
  0x49   : > { %588 = vsyncadd [#allocation3 + $0x3], 16  ;;  %s589_s13 = sadd.s32 4, %s2944_s25 }
  0x4a   : > { %s590_s15 = sld [smem:[#allocation5 + %s589_s13]] }
  0x50   : > { %s591_s29 = scalar_lea.vmem %s3351_s12, %s590_s15 }
  0x51   : > { %v612_v4 = vld [vmem:[%s591_s29] sm:$0x1] }
  0x52   : > { %613 = vst [vmem:[#allocation2 + $0x4] sm:$0x1] %v612_v4 }
  0x53   : > { %639 = vsyncadd [#allocation3 + $0x4], 16  ;;  %s640_s27 = sadd.s32 5, %s2944_s25 }
  0x54   : > { %s641_s21 = sld [smem:[#allocation5 + %s640_s27]] }
  0x5a   : > { %s642_s24 = scalar_lea.vmem %s3351_s12, %s641_s21 }
  0x5b   : > { %v663_v5 = vld [vmem:[%s642_s24] sm:$0x1] }
  0x5c   : > { %664 = vst [vmem:[#allocation2 + $0x5] sm:$0x1] %v663_v5 }
  0x5d   : > { %690 = vsyncadd [#allocation3 + $0x5], 16  ;;  %s691_s17 = sadd.s32 6, %s2944_s25 }
  0x5e   : > { %s692_s18 = sld [smem:[#allocation5 + %s691_s17]] }
  0x64   : > { %s693_s15 = scalar_lea.vmem %s3351_s12, %s692_s18 }
  0x65   : > { %v714_v6 = vld [vmem:[%s693_s15] sm:$0x1] }
  0x66   : > { %715 = vst [vmem:[#allocation2 + $0x6] sm:$0x1] %v714_v6 }
  0x67   : > { %741 = vsyncadd [#allocation3 + $0x6], 16  ;;  %s742_s23 = sadd.s32 7, %s2944_s25 }
  0x68   : > { %s743_s28 = sld [smem:[#allocation5 + %s742_s23]] }
  0x6e   : > { %s744_s21 = scalar_lea.vmem %s3351_s12, %s743_s28 }
  0x6f   : > { %v765_v7 = vld [vmem:[%s744_s21] sm:$0x1] }
  0x70   : > { %766 = vst [vmem:[#allocation2 + $0x7] sm:$0x1] %v765_v7 }
  0x71   : > { %792 = vsyncadd [#allocation3 + $0x7], 16 }
  0x72   : > { %2773 = dma.done.wait [#allocation3], 16 }
  0x73   : > { %2774 = vsyncadd [#allocation3], 4294967280 }
  0x74   : > { %2775 = dma.done.wait [#allocation3 + $0x1], 16 }
  0x75   : > { %2776 = vsyncadd [#allocation3 + $0x1], 4294967280 }
  0x76   : > { %2777 = dma.done.wait [#allocation3 + $0x2], 16 }
  0x77   : > { %2778 = vsyncadd [#allocation3 + $0x2], 4294967280 }
  0x78   : > { %2779 = dma.done.wait [#allocation3 + $0x3], 16 }
  0x79   : > { %2780 = vsyncadd [#allocation3 + $0x3], 4294967280 }
  0x7a   : > { %2781 = dma.done.wait [#allocation3 + $0x4], 16 }
  0x7b   : > { %2782 = vsyncadd [#allocation3 + $0x4], 4294967280 }
  0x7c   : > { %2783 = dma.done.wait [#allocation3 + $0x5], 16 }
  0x7d   : > { %2784 = vsyncadd [#allocation3 + $0x5], 4294967280 }
  0x7e   : > { %2785 = dma.done.wait [#allocation3 + $0x6], 16 }
  0x7f   : > { %2786 = vsyncadd [#allocation3 + $0x6], 4294967280 }
  0x80   : > { %2787 = dma.done.wait [#allocation3 + $0x7], 16 }
  0x81   : > { %2788 = vsyncadd [#allocation3 + $0x7], 4294967280  ;;  %v810_v8 = vld [vmem:[#allocation2] sm:$0xff]  ;;  %vm815_vm0 = vcmask 261120   ;;  %v2663_v17 = vld [vmem:[%s3344_s5 + $0x8] sm:$0xff]   ;;  %v2810_v18 = vmov 0.0   ;;  %v968_v42 = vlaneseq  ;;  %s3370_s24 = scalar_lea.vmem %s3340_s1, %s2947_s26 }
  0x82   : > { %v811_v9 = vld [vmem:[%s3341_s2] sm:$0xff]  ;;  %2481 = vmatprep.subr.bf16.mxu0 %v2810_v18  ;;  %vm2811_vm1 = vmmov 0   ;;  %2489 = vmatprep.subr.bf16.mxu1 %v2810_v18  ;;  %s2812_s27 = smov 112   ;;  %s2813_s21 = smov 96   ;;  %vm919_vm2 = vcmask 130048   ;;  %vm974_vm4 = vcmask 64512  }
  0x83   : > { %v812_v10 = vadd.f32 %v811_v9, %v810_v8  ;;  %2485 = vmatprep.mubr.msk.bf16.mxu0 %vm2811_vm1, %v2810_v18  ;;  %2482 = vmatpush3.bf16.msra.mxu0 %v2663_v17  ;;  %v2664_v19 = vld [vmem:[%s3344_s5] sm:$0xff]   ;;  %s2814_s25 = smov 80   ;;  %v3050_v44 = vshrl.u32 %v968_v42, 7  ;;  %v2815_v46 = vmov -1e+09   ;;  %s2816_s26 = smov 48  }
  0x84   : > { %2483 = vmatprep.subr.bf16.mxu0 %v2810_v18  ;;  %2491 = vmatprep.mubr.msk.bf16.mxu1 %vm2811_vm1, %v2810_v18  ;;  %v2352_v24 = vld [vmem:[%s3342_s3] ss:$0 sm:$0xff]  ;;  %v2353_v26 = vld [vmem:[%s3342_s3 + $0x1] ss:$0 sm:$0xff]  ;;  %s2817_s17 = smov 64   ;;  %vm992_vm5 = vcmask 1043456  }
  0x85   : > { %v816_v11 = vsel %vm815_vm0, %v812_v10, 0.0  ;;  %v2354_v30 = vld [vmem:[%s3345_s6] ss:$0 sm:$0xff]  ;;  %v3054_v45 = vsub.s32 0, %v3050_v44  ;;  %s2818_s23 = smov 16   ;;  %vm1350_vm6 = vcmask 523264  }
  0x86   : > { %817 = vadd.xlane.f32.xlu0 %v816_v11  ;;  %v3048_v43 = vld [vmem:[%s3370_s24] sm:$0x1]  ;;  %vm2063_vm7 = vcmask 57344   ;;  %s2421_s13 = sshll.u32 %s2914_s16, 4  ;;  %s2145_s15 = sshll.u32 %s2959_s0, 4  ;;  %vm2130_vm8 = vcmask 122880   ;;  %s3297_s15 = int_to_ptr.vmem [resolvable:$true] %s2145_s15 }
  0x87   : > { %2484 = vmatpush3.bf16.msra.mxu0 %v2664_v19  ;;  %vm841_vm3 = vcmp.gt.f32.partialorder %v3048_v43, 0.5  ;;  %s3371_s19 = sld [smem:[#allocation32_spill]]  ;;  %s2819_s16 = smov [#allocation6]  }
  0x88   : > { %2495 = vmatprep.subr.bf16.mxu0 %v2810_v18  ;;  %v842_v47 = vsel %vm841_vm3, 0.0, %v2815_v46 }
  0x89   : > { %v3057_v48 = vrot.slane %v842_v47, %v3054_v45 }
  0x8d   : > { %s3295_s20 = scalar_lea.hbm %s3371_s19, %s2421_s13 }
 0x10f   : > { %v818_v12 = vpop.xlane.xlu0 %817 }
 0x110   : > { %v820_v13 = vmul.f32 0.03125, %v818_v12 }
 0x112   : > { %v821_v14 = vsub.f32 %v812_v10, %v820_v13 }
 0x114   : > { %v822_v15 = vmul.f32 %v821_v14, %v821_v14 }
 0x116   : > { %v823_v16 = vsel %vm815_vm0, %v822_v15, 0.0 }
 0x117   : > { %824 = vadd.xlane.f32.xlu0 %v823_v16 }
 0x1a0   : > { %v825_v20 = vpop.xlane.xlu0 %824 }
 0x1a1   : > { %v826_v21 = vmul.f32 0.03125, %v825_v20 }
 0x1a3   : > { %v827_v22 = vadd.f32 1e-12, %v826_v21 }
 0x1a5   : > { %2685 = vrsqrt.f32 %v827_v22  ;;  %v2665_v22 = vld [vmem:[%s3346_s7 + $0x8] sm:$0xff]  }
 0x1b2   : > { %v2686_v23 = vpop.eup %2685 }
 0x1b3   : > { %v829_v25 = vmul.f32 %v2686_v23, %v821_v14  ;;  %v2666_v23 = vld [vmem:[%s3346_s7] sm:$0xff]  }
 0x1b5   : > { %v834_v27 = vmul.f32 %v2352_v24, %v829_v25 }
 0x1b7   : > { %v3014_v28 = vadd.f32 %v2353_v26, %v834_v27 }
 0x1b9   : > { %v853_v29 = vpack.c.bf16 %v3014_v28, %v3014_v28 }
 0x1bb   : > { %2486 = vmatmul.mubr.msk.bf16.vlgmr.msra.gmra.mxu0 %vm815_vm0, %v853_v29 }
 0x1bc   : > { %2497 = vmatprep.mubr.msk.bf16.mxu0 %vm2811_vm1, %v2810_v18 }
 0x27b   : > { %v909_v31 = vpop.f32.mrf.mxu0 }
 0x27c   : > { %v910_v32 = vadd.f32 %v2354_v30, %v909_v31 }
 0x27d   : > { %v2487_v33 = vpop.f32.mrf.mxu0 }
 0x27e   : > { %v3024_v34 = vpack.c.bf16 %v910_v32, %v910_v32 }
 0x27f   : > { %v912_v35 = vpop.f32.mrf.mxu0 }
 0x280   : > { %1036 = vrot.lane.b32.xlu0 %v3024_v34, %s2812_s27  ;;  %917 = vrot.lane.b32.xlu1 %v3024_v34, %s2813_s21 }
 0x281   : > { %v2488_v36 = vpop.f32.mrf.mxu0 }
 0x282   : > { %v3095_v36 = vld [vmem:[%s3347_s8] sm:$0x3f] }
 0x284   : > { %1038 = vrot.lane.b32.xlu1 %v3024_v34, %s2814_s25 }
 0x2f2   : > { %v918_v37 = vpop.permute.xlu1 %917  ;;  %v1037_v41 = vpop.permute.xlu0 %1036 }
 0x2f3   : > { %v924_v38 = vsel %vm919_vm2, %v918_v37, 0  ;;  %v1157_v37 = vrot.slane %v3095_v36, %v3054_v45 }
 0x2f4   : > { %2490 = vmatpush3.bf16.xpose.msra.mxu1 %v924_v38 }
 0x2f5   : > { %2501 = vmatprep.subr.bf16.mxu1 %v2810_v18 }
 0x2f6   : > { %v1039_v39 = vpop.permute.xlu1 %1038 }
 0x2f7   : > { %v1044_v40 = vsel %vm919_vm2, %v1039_v39, 0 }
 0x2fb   : > { %2492 = vmatmul.mubr.msk.bf16.vlgmr.msra.gmra.mxu1 %vm919_vm2, %v3024_v34 }
 0x2fc   : > { %2502 = vmatpush3.bf16.xpose.msra.mxu1 %v1044_v40  ;;  %2503 = vmatprep.mubr.msk.bf16.mxu1 %vm2811_vm1, %v2810_v18 }
 0x2fd   : > { %2513 = vmatprep.subr.bf16.mxu1 %v2810_v18 }
 0x303   : > { %2504 = vmatmul.mubr.msk.bf16.vlgmr.msra.gmra.mxu1 %vm919_vm2, %v1037_v41 }
 0x304   : > { %2517 = vmatprep.mubr.msk.bf16.mxu1 %vm2811_vm1, %v2810_v18  ;;  %2514 = vmatpush3.bf16.msra.mxu1 %v2665_v22 }
 0x305   : > { %2515 = vmatprep.subr.bf16.mxu1 %v2810_v18 }
 0x308   : > { %2516 = vmatpush3.bf16.msra.mxu1 %v2666_v23 }
 0x309   : > { %2529 = vmatprep.subr.bf16.mxu1 %v2810_v18 }
 0x3bb   : > { %v960_v49 = vpop.f32.mrf.mxu1 }
 0x3bc   : > { %v966_v50 = vmul.f32 0.25, %v960_v49 }
 0x3bd   : > { %v2493_v51 = vpop.f32.mrf.mxu1 }
 0x3be   : > { %v973_v52 = vadd.f32 %v3057_v48, %v966_v50 }
 0x3bf   : > { %v963_v53 = vpop.f32.mrf.mxu1 }
 0x3c0   : > { %v975_v54 = vsel %vm974_vm4, %v973_v52, -inf }
 0x3c1   : > { %976 = vmax.xlane.f32.xlu1 %v975_v54  ;;  %v2494_v55 = vpop.f32.mrf.mxu1  ;;  %v2667_v54 = vld [vmem:[%s3348_s9 + $0x8] sm:$0xff]  }
 0x3c3   : > { %v1080_v56 = vpop.f32.mrf.mxu1 }
 0x3c4   : > { %v1086_v57 = vmul.f32 0.25, %v1080_v56 }
 0x3c5   : > { %v2505_v58 = vpop.f32.mrf.mxu1 }
 0x3c6   : > { %v1087_v59 = vadd.f32 %v1086_v57, %v3057_v48  ;;  %v1229_v58 = vsub.s32 1, %v3050_v44 }
 0x3c7   : > { %v1083_v60 = vpop.f32.mrf.mxu1 }
 0x3c8   : > { %v1088_v61 = vsel %vm974_vm4, %v1087_v59, -inf  ;;  %v1230_v60 = vrot.slane %v3095_v36, %v1229_v58 }
 0x3c9   : > { %1089 = vmax.xlane.f32.xlu0 %v1088_v61  ;;  %v2506_v62 = vpop.f32.mrf.mxu1 }
 0x3df   : > { %1100 = vrot.lane.b32.xlu0 %v3024_v34, %s2816_s26 }
 0x44a   : > { %v977_v63 = vpop.xlane.xlu1 %976 }
 0x44b   : > { %v978_v0 = vsub.f32 %v973_v52, %v977_v63 }
 0x44d   : > { %v979_v1 = vmul.f32 1.442695, %v978_v0 }
 0x44f   : > { %2687 = vpow2.f32 %v979_v1 }
 0x452   : > { %v1090_v2 = vpop.xlane.xlu0 %1089 }
 0x453   : > { %v1091_v3 = vsub.f32 %v1087_v59, %v1090_v2  ;;  %v1234_v59 = vsub.s32 2, %v3050_v44 }
 0x455   : > { %v1092_v4 = vmul.f32 1.442695, %v1091_v3  ;;  %v1235_v63 = vrot.slane %v3095_v36, %v1234_v59  ;;  %v2669_v3 = vld [vmem:[%s3350_s11 + $0x18] sm:$0xff]  }
 0x456   : > { %v1101_v15 = vpop.permute.xlu0 %1100 }
 0x457   : > { %2689 = vpow2.f32 %v1092_v4  ;;  %v1106_v17 = vsel %vm992_vm5, %v1101_v15, 0  ;;  %v2670_v4 = vld [vmem:[%s3350_s11 + $0x10] sm:$0xff]  }
 0x45c   : > { %v2688_v5 = vpop.eup %2687 }
 0x45d   : > { %v981_v6 = vsel %vm974_vm4, %v2688_v5, 0.0 }
 0x45e   : > { %982 = vadd.xlane.f32.xlu1 %v981_v6  ;;  %v2672_v6 = vld [vmem:[%s3350_s11] sm:$0xff]  }
 0x464   : > { %v2690_v7 = vpop.eup %2689 }
 0x465   : > { %v1094_v8 = vsel %vm974_vm4, %v2690_v7, 0.0 }
 0x466   : > { %1095 = vadd.xlane.f32.xlu1 %v1094_v8 }
 0x477   : > { %987 = vrot.lane.b32.xlu1 %v3024_v34, %s2817_s17 }
 0x4e7   : > { %v983_v9 = vpop.xlane.xlu1 %982 }
 0x4e8   : > { %2691 = vrcp.f32 %v983_v9 }
 0x4ef   : > { %v1096_v10 = vpop.xlane.xlu1 %1095 }
 0x4f0   : > { %2693 = vrcp.f32 %v1096_v10 }
 0x4f3   : > { %v988_v11 = vpop.permute.xlu1 %987 }
 0x4f4   : > { %v994_v12 = vsel %vm992_vm5, %v988_v11, 0 }
 0x4f5   : > { %v2692_v13 = vpop.eup %2691  ;;  %2496 = vmatpush3.bf16.msra.mxu0 %v994_v12 }
 0x4f6   : > { %2507 = vmatprep.subr.bf16.mxu0 %v2810_v18  ;;  %v985_v14 = vmul.f32 %v2692_v13, %v2688_v5  ;;  %v2671_v5 = vld [vmem:[%s3350_s11 + $0x8] sm:$0xff]  }
 0x4f8   : > { %v986_v16 = vpack.c.bf16 %v985_v14, %v985_v14 }
 0x4fa   : > { %2498 = vmatmul.mubr.msk.bf16.vlgmr.msra.gmra.mxu0 %vm974_vm4, %v986_v16 }
 0x4fb   : > { %2508 = vmatpush3.bf16.msra.mxu0 %v1106_v17  ;;  %2509 = vmatprep.mubr.msk.bf16.mxu0 %vm2811_vm1, %v2810_v18 }
 0x4fc   : > { %2521 = vmatprep.subr.bf16.mxu0 %v2810_v18 }
 0x4fd   : > { %v2694_v19 = vpop.eup %2693 }
 0x4fe   : > { %v1098_v20 = vmul.f32 %v2694_v19, %v2690_v7  ;;  %v2365_v7 = vld [vmem:[%s3349_s10] ss:$0 sm:$0xff] }
 0x500   : > { %v1099_v21 = vpack.c.bf16 %v1098_v20, %v1098_v20 }
 0x502   : > { %2510 = vmatmul.mubr.msk.bf16.vlgmr.msra.gmra.mxu0 %vm974_vm4, %v1099_v21 }
 0x503   : > { %2525 = vmatprep.mubr.msk.bf16.mxu0 %vm2811_vm1, %v2810_v18  ;;  %2522 = vmatpush3.bf16.msra.mxu0 %v2667_v54 }
 0x504   : > { %2523 = vmatprep.subr.bf16.mxu0 %v2810_v18 }
 0x5ba   : > { %v1030_v24 = vpop.f32.mrf.mxu0 }
 0x5bc   : > { %v2499_v25 = vpop.f32.mrf.mxu0 }
 0x5be   : > { %v1033_v26 = vpop.f32.mrf.mxu0 }
 0x5c0   : > { %v2500_v27 = vpop.f32.mrf.mxu0 }
 0x5c2   : > { %v1142_v29 = vpop.f32.mrf.mxu0 }
 0x5c3   : > { %1149 = vrot.lane.b32.xlu1 %v1142_v29, %s2818_s23 }
 0x5c4   : > { %v2511_v30 = vpop.f32.mrf.mxu0 }
 0x5c6   : > { %v1145_v31 = vpop.f32.mrf.mxu0 }
 0x5c8   : > { %v2512_v32 = vpop.f32.mrf.mxu0 }
 0x635   : > { %v1150_v33 = vpop.permute.xlu1 %1149 }
 0x636   : > { %v1152_v34 = vsel %vm919_vm2, %v1030_v24, %v1150_v33  ;;  %v1324_v24 = vsub.s32 3, %v3050_v44 }
 0x637   : > { %v1153_v35 = vpack.c.bf16 %v1152_v34, %v1152_v34 }
 0x638   : > { %v1325_v25 = vrot.slane %v3095_v36, %v1324_v24 }
 0x639   : > { %2518 = vmatmul.mubr.msk.bf16.vlgmr.msra.gmra.mxu1 %vm815_vm0, %v1153_v35 }
 0x63a   : > { %2537 = vmatprep.mubr.msk.bf16.mxu1 %vm2811_vm1, %v2810_v18  ;;  %2530 = vmatpush3.bf16.msra.mxu1 %v2669_v3 }
 0x63b   : > { %2531 = vmatprep.subr.bf16.mxu1 %v2810_v18 }
 0x63e   : > { %2532 = vmatpush3.bf16.msra.mxu1 %v2670_v4 }
 0x63f   : > { %2533 = vmatprep.subr.bf16.mxu1 %v2810_v18 }
 0x642   : > { %2534 = vmatpush3.bf16.msra.mxu1 %v2671_v5 }
 0x643   : > { %2535 = vmatprep.subr.bf16.mxu1 %v2810_v18 }
 0x646   : > { %2536 = vmatpush3.bf16.msra.mxu1 %v2672_v6 }
 0x647   : > { %2555 = vmatprep.subr.bf16.mxu1 %v2810_v18 }
 0x6f9   : > { %v1207_v38 = vpop.f32.mrf.mxu1 }
 0x6fa   : > { %v1208_v39 = vadd.f32 %v1207_v38, %v1157_v37 }
 0x6fb   : > { %v2519_v40 = vpop.f32.mrf.mxu1 }
 0x6fc   : > { %v1213_v41 = vadd.f32 %v1208_v39, %v3014_v28  ;;  %v2668_v28 = vld [vmem:[%s3348_s9] sm:$0xff]   ;;  %v2673_v40 = vld [vmem:[%s3344_s5 + $0x18] sm:$0xff]  }
 0x6fd   : > { %v1210_v42 = vpop.f32.mrf.mxu1  ;;  %2524 = vmatpush3.bf16.msra.mxu0 %v2668_v28 }
 0x6fe   : > { %v1214_v46 = vsel %vm815_vm0, %v1213_v41, 0.0  ;;  %2541 = vmatprep.subr.bf16.mxu0 %v2810_v18 }
 0x6ff   : > { %1215 = vadd.xlane.f32.xlu1 %v1214_v46  ;;  %v2520_v47 = vpop.f32.mrf.mxu1 }
 0x788   : > { %v1216_v49 = vpop.xlane.xlu1 %1215 }
 0x789   : > { %v1217_v50 = vmul.f32 0.03125, %v1216_v49  ;;  %v1410_v49 = vsub.s32 4, %v3050_v44 }
 0x78b   : > { %v1218_v51 = vsub.f32 %v1213_v41, %v1217_v50  ;;  %v2674_v41 = vld [vmem:[%s3344_s5 + $0x10] sm:$0xff]   ;;  %v1415_v50 = vsub.s32 5, %v3050_v44  ;;  %v2684_v44 = vld [vmem:[%s3343_s4] sm:$0xff]  }
 0x78d   : > { %v1219_v52 = vmul.f32 %v1218_v51, %v1218_v51  ;;  %v1416_v54 = vrot.slane %v3095_v36, %v1415_v50 }
 0x78f   : > { %v1220_v53 = vsel %vm815_vm0, %v1219_v52, 0.0 }
 0x790   : > { %1221 = vadd.xlane.f32.xlu0 %v1220_v53 }
 0x819   : > { %v1222_v55 = vpop.xlane.xlu0 %1221 }
 0x81a   : > { %v1223_v56 = vmul.f32 0.03125, %v1222_v55 }
 0x81c   : > { %v1224_v57 = vadd.f32 1e-12, %v1223_v56 }
 0x81e   : > { %2695 = vrsqrt.f32 %v1224_v57  ;;  %v2384_v57 = vld [vmem:[%s3345_s6 + $0x1] ss:$0 sm:$0xff] }
 0x82b   : > { %v2696_v61 = vpop.eup %2695 }
 0x82c   : > { %v1226_v62 = vmul.f32 %v2696_v61, %v1218_v51  ;;  %v1411_v51 = vrot.slane %v3095_v36, %v1410_v49 }
 0x82e   : > { %v1231_v0 = vmul.f32 %v1230_v60, %v1226_v62 }
 0x830   : > { %v1236_v1 = vadd.f32 %v1235_v63, %v1231_v0 }
 0x832   : > { %v1237_v2 = vpack.c.bf16 %v1236_v1, %v1236_v1 }
 0x834   : > { %2526 = vmatmul.mubr.msk.bf16.vlgmr.msra.gmra.mxu0 %vm815_vm0, %v1237_v2 }
 0x835   : > { %2545 = vmatprep.mubr.msk.bf16.mxu0 %vm2811_vm1, %v2810_v18  ;;  %2542 = vmatpush3.bf16.msra.mxu0 %v2673_v40 }
 0x836   : > { %2543 = vmatprep.subr.bf16.mxu0 %v2810_v18 }
 0x839   : > { %2544 = vmatpush3.bf16.msra.mxu0 %v2674_v41 }
 0x83a   : > { %2549 = vmatprep.subr.bf16.mxu0 %v2810_v18 }
 0x8f4   : > { %v1298_v8 = vpop.f32.mrf.mxu0 }
 0x8f5   : > { %v1299_v9 = vadd.f32 %v2365_v7, %v1298_v8 }
 0x8f6   : > { %v2527_v10 = vpop.f32.mrf.mxu0 }
 0x8f7   : > { %v1304_v11 = vmul.f32 %v1299_v9, %v1299_v9 }
 0x8f8   : > { %v1301_v12 = vpop.f32.mrf.mxu0 }
 0x8f9   : > { %v1305_v13 = vmul.f32 %v1304_v11, %v1299_v9 }
 0x8fa   : > { %v2528_v14 = vpop.f32.mrf.mxu0 }
 0x8fb   : > { %v1306_v15 = vmul.f32 0.044715, %v1305_v13 }
 0x8fd   : > { %v1307_v16 = vadd.f32 %v1306_v15, %v1299_v9 }
 0x8ff   : > { %v1308_v17 = vmul.f32 0.7978846, %v1307_v16 }
 0x901   : > { %2697 = vtanh.f32 %v1308_v17 }
 0x90e   : > { %v2698_v19 = vpop.eup %2697 }
 0x90f   : > { %v1310_v20 = vadd.f32 1.0, %v2698_v19 }
 0x911   : > { %v1311_v21 = vmul.f32 0.5, %v1310_v20 }
 0x913   : > { %v1312_v22 = vmul.f32 %v1311_v21, %v1299_v9 }
 0x915   : > { %v1313_v23 = vpack.c.bf16 %v1312_v22, %v1312_v22 }
 0x917   : > { %2538 = vmatmul.mubr.msk.bf16.vlgmr.msra.gmra.mxu1 %vm1350_vm6, %v1313_v23 }
 0x918   : > { %2557 = vmatprep.mubr.msk.bf16.mxu1 %vm2811_vm1, %v2810_v18 }
 0x9d7   : > { %v1388_v26 = vpop.f32.mrf.mxu1 }
 0x9d8   : > { %v1389_v27 = vadd.f32 %v1388_v26, %v1325_v25 }
 0x9d9   : > { %v2539_v29 = vpop.f32.mrf.mxu1 }
 0x9da   : > { %v1394_v30 = vadd.f32 %v1389_v27, %v1236_v1 }
 0x9db   : > { %v1391_v31 = vpop.f32.mrf.mxu1 }
 0x9dc   : > { %v1395_v32 = vsel %vm815_vm0, %v1394_v30, 0.0 }
 0x9dd   : > { %1396 = vadd.xlane.f32.xlu1 %v1395_v32  ;;  %v2540_v33 = vpop.f32.mrf.mxu1 }
 0xa66   : > { %v1397_v34 = vpop.xlane.xlu1 %1396 }
 0xa67   : > { %v1398_v35 = vmul.f32 0.03125, %v1397_v34 }
 0xa69   : > { %v1399_v37 = vsub.f32 %v1394_v30, %v1398_v35 }
 0xa6b   : > { %v1400_v38 = vmul.f32 %v1399_v37, %v1399_v37 }
 0xa6d   : > { %v1401_v39 = vsel %vm815_vm0, %v1400_v38, 0.0 }
 0xa6e   : > { %1402 = vadd.xlane.f32.xlu1 %v1401_v39 }
 0xaf7   : > { %v1403_v42 = vpop.xlane.xlu1 %1402 }
 0xaf8   : > { %v1404_v46 = vmul.f32 0.03125, %v1403_v42 }
 0xafa   : > { %v1405_v47 = vadd.f32 1e-12, %v1404_v46 }
 0xafc   : > { %2699 = vrsqrt.f32 %v1405_v47 }
 0xb09   : > { %v2700_v52 = vpop.eup %2699 }
 0xb0a   : > { %v1407_v53 = vmul.f32 %v2700_v52, %v1399_v37  ;;  %v2676_v52 = vld [vmem:[%s3346_s7 + $0x10] sm:$0xff]  }
 0xb0c   : > { %v1412_v28 = vmul.f32 %v1411_v51, %v1407_v53  ;;  %v2675_v51 = vld [vmem:[%s3346_s7 + $0x18] sm:$0xff]  }
 0xb0e   : > { %v3165_v55 = vadd.f32 %v1416_v54, %v1412_v28 }
 0xb10   : > { %v1432_v56 = vpack.c.bf16 %v3165_v55, %v3165_v55 }
 0xb12   : > { %2546 = vmatmul.mubr.msk.bf16.vlgmr.msra.gmra.mxu0 %vm815_vm0, %v1432_v56 }
 0xb13   : > { %2551 = vmatprep.mubr.msk.bf16.mxu0 %vm2811_vm1, %v2810_v18 }
 0xbd2   : > { %v1488_v60 = vpop.f32.mrf.mxu0 }
 0xbd3   : > { %v1489_v61 = vadd.f32 %v2384_v57, %v1488_v60 }
 0xbd4   : > { %v2547_v62 = vpop.f32.mrf.mxu0 }
 0xbd5   : > { %v1494_v63 = vpack.c.bf16 %v1489_v61, %v1489_v61 }
 0xbd6   : > { %v1491_v36 = vpop.f32.mrf.mxu0 }
 0xbd7   : > { %1608 = vrot.lane.b32.xlu1 %v1494_v63, %s2814_s25  ;;  %1496 = vrot.lane.b32.xlu0 %v1494_v63, %s2813_s21  ;;  %s2729_s25 = scalar_lea.vmem %s3297_s15, 16 }
 0xbd8   : > { %v2548_v0 = vpop.f32.mrf.mxu0  ;;  %p2730_p2 = scmp.ne.s32.totalorder %s3297_s15, %s2729_s25 }
 0xbda   : > { %p2731_p3 = pnand %p2730_p2, %p2931_p10 }
 0xbdb   : > { %1606 = vrot.lane.b32.xlu1 %v1494_v63, %s2812_s27  ;;  %s3372_s27 = sand.u32 1, %s2799_s14  }
 0xbdc   : > { %s2133_s21 = scalar_lea.sflag [#allocation7], %s3372_s27  ;;  %p2732_p4 = pneg %p2731_p3 }
 0xc49   : > { %v1497_v1 = vpop.permute.xlu0 %1496  ;;  %v1609_v3 = vpop.permute.xlu1 %1608 }
 0xc4a   : > { %v1502_v2 = vsel %vm919_vm2, %v1497_v1, 0  ;;  %v1614_v4 = vsel %vm919_vm2, %v1609_v3, 0  ;;  %v3222_v1 = vld [vmem:[%s3347_s8 + $0x8] sm:$0x3f] }
 0xc4b   : > { %2550 = vmatpush3.bf16.xpose.msra.mxu0 %v1502_v2  ;;  %v1727_v2 = vrot.slane %v3222_v1, %v3054_v45  ;;  %v2677_v45 = vld [vmem:[%s3348_s9 + $0x18] sm:$0xff]  }
 0xc4c   : > { %2561 = vmatprep.subr.bf16.mxu0 %v2810_v18 }
 0xc4d   : > { %v1607_v5 = vpop.permute.xlu1 %1606 }
 0xc52   : > { %2552 = vmatmul.mubr.msk.bf16.vlgmr.msra.gmra.mxu0 %vm919_vm2, %v1494_v63 }
 0xc53   : > { %2562 = vmatpush3.bf16.xpose.msra.mxu0 %v1614_v4  ;;  %2563 = vmatprep.mubr.msk.bf16.mxu0 %vm2811_vm1, %v2810_v18 }
 0xc54   : > { %2573 = vmatprep.subr.bf16.mxu0 %v2810_v18 }
 0xc5a   : > { %2564 = vmatmul.mubr.msk.bf16.vlgmr.msra.gmra.mxu0 %vm919_vm2, %v1607_v5 }
 0xc5b   : > { %2577 = vmatprep.mubr.msk.bf16.mxu0 %vm2811_vm1, %v2810_v18  ;;  %2574 = vmatpush3.bf16.msra.mxu0 %v2675_v51 }
 0xc5c   : > { %2575 = vmatprep.subr.bf16.mxu0 %v2810_v18 }
 0xc5f   : > { %2576 = vmatpush3.bf16.msra.mxu0 %v2676_v52  ;;  %v1898_v52 = vrot.slane %v3222_v1, %v1324_v24 }
 0xc60   : > { %2589 = vmatprep.subr.bf16.mxu0 %v2810_v18 }
 0xd12   : > { %v1538_v6 = vpop.f32.mrf.mxu0 }
 0xd13   : > { %v1544_v7 = vmul.f32 0.25, %v1538_v6 }
 0xd14   : > { %v2553_v8 = vpop.f32.mrf.mxu0 }
 0xd15   : > { %v1545_v9 = vadd.f32 %v1544_v7, %v3057_v48 }
 0xd16   : > { %v1541_v10 = vpop.f32.mrf.mxu0 }
 0xd17   : > { %v1546_v11 = vsel %vm974_vm4, %v1545_v9, -inf }
 0xd18   : > { %1547 = vmax.xlane.f32.xlu0 %v1546_v11  ;;  %v2554_v12 = vpop.f32.mrf.mxu0 }
 0xd1a   : > { %v1650_v13 = vpop.f32.mrf.mxu0 }
 0xd1b   : > { %v1656_v14 = vmul.f32 0.25, %v1650_v13 }
 0xd1c   : > { %v2565_v15 = vpop.f32.mrf.mxu0 }
 0xd1d   : > { %v1657_v16 = vadd.f32 %v1656_v14, %v3057_v48 }
 0xd1e   : > { %v1653_v17 = vpop.f32.mrf.mxu0 }
 0xd1f   : > { %v1658_v19 = vsel %vm974_vm4, %v1657_v16, -inf }
 0xd20   : > { %1659 = vmax.xlane.f32.xlu1 %v1658_v19  ;;  %v2566_v20 = vpop.f32.mrf.mxu0  ;;  %v1800_v19 = vrot.slane %v3222_v1, %v1229_v58  ;;  %v2680_v58 = vld [vmem:[%s3350_s11 + $0x30] sm:$0xff]  }
 0xd31   : > { %1558 = vrot.lane.b32.xlu1 %v1494_v63, %s2817_s17 }
 0xda1   : > { %v1548_v21 = vpop.xlane.xlu0 %1547 }
 0xda2   : > { %v1549_v22 = vsub.f32 %v1545_v9, %v1548_v21 }
 0xda4   : > { %v1550_v23 = vmul.f32 1.442695, %v1549_v22  ;;  %v1805_v22 = vrot.slane %v3222_v1, %v1234_v59  ;;  %v2681_v59 = vld [vmem:[%s3350_s11 + $0x28] sm:$0xff]  }
 0xda6   : > { %2701 = vpow2.f32 %v1550_v23 }
 0xda9   : > { %v1660_v25 = vpop.xlane.xlu1 %1659 }
 0xdaa   : > { %v1661_v26 = vsub.f32 %v1657_v16, %v1660_v25 }
 0xdac   : > { %v1662_v27 = vmul.f32 1.442695, %v1661_v26 }
 0xdad   : > { %v1559_v29 = vpop.permute.xlu1 %1558 }
 0xdae   : > { %2703 = vpow2.f32 %v1662_v27  ;;  %v1564_v30 = vsel %vm992_vm5, %v1559_v29, 0  ;;  %v2679_v27 = vld [vmem:[%s3350_s11 + $0x38] sm:$0xff]   ;;  %v2682_v29 = vld [vmem:[%s3350_s11 + $0x20] sm:$0xff]  }
 0xdaf   : > { %2556 = vmatpush3.bf16.msra.mxu1 %v1564_v30  ;;  %v2400_v30 = vld [vmem:[%s3349_s10 + $0x1] ss:$0 sm:$0xff] }
 0xdb0   : > { %2567 = vmatprep.subr.bf16.mxu1 %v2810_v18 }
 0xdb3   : > { %v2702_v48 = vpop.eup %2701 }
 0xdb4   : > { %v1552_v31 = vsel %vm974_vm4, %v2702_v48, 0.0 }
 0xdb5   : > { %1553 = vadd.xlane.f32.xlu0 %v1552_v31 }
 0xdbb   : > { %v2704_v32 = vpop.eup %2703 }
 0xdbc   : > { %v1664_v33 = vsel %vm974_vm4, %v2704_v32, 0.0 }
 0xdbd   : > { %1665 = vadd.xlane.f32.xlu0 %v1664_v33 }
 0xdd3   : > { %1670 = vrot.lane.b32.xlu0 %v1494_v63, %s2816_s26  ;;  %s2733_s26 = sshll.u32 %s2819_s16, 4  ;;  %s2734_s26 = int_to_ptr.vmem [resolvable:$false] %s2733_s26 }
 0xdd4   : > { %s2735_s17 = scalar_lea.vmem %s2734_s26, 32  ;;  %p2736_p5 = scmp.lt.s32.totalorder %s3297_s15, %s2734_s26 }
 0xdd5   : > { %p2737_p6 = scmp.lt.s32.totalorder %s2735_s17, %s2729_s25 }
 0xdd7   : > { %p2738_p7 = por %p2737_p6, %p2736_p5 }
 0xdd9   : > { %p2739_p8 = pnand %p2738_p7, %p2732_p4 }
 0xe3e   : > { %v1554_v34 = vpop.xlane.xlu0 %1553 }
 0xe3f   : > { %2705 = vrcp.f32 %v1554_v34 }
 0xe46   : > { %v1666_v35 = vpop.xlane.xlu0 %1665 }
 0xe47   : > { %2707 = vrcp.f32 %v1666_v35 }
 0xe4a   : > { %v1671_v39 = vpop.permute.xlu0 %1670 }
 0xe4b   : > { %v1676_v41 = vsel %vm992_vm5, %v1671_v39, 0 }
 0xe4c   : > { %v2706_v37 = vpop.eup %2705 }
 0xe4d   : > { %v1556_v38 = vmul.f32 %v2706_v37, %v2702_v48 }
 0xe4f   : > { %v1557_v40 = vpack.c.bf16 %v1556_v38, %v1556_v38 }
 0xe51   : > { %2558 = vmatmul.mubr.msk.bf16.vlgmr.msra.gmra.mxu1 %vm974_vm4, %v1557_v40 }
 0xe52   : > { %2568 = vmatpush3.bf16.msra.mxu1 %v1676_v41  ;;  %2569 = vmatprep.mubr.msk.bf16.mxu1 %vm2811_vm1, %v2810_v18 }
 0xe53   : > { %2581 = vmatprep.subr.bf16.mxu1 %v2810_v18 }
 0xe54   : > { %v2708_v42 = vpop.eup %2707 }
 0xe55   : > { %v1668_v46 = vmul.f32 %v2708_v42, %v2704_v32 }
 0xe57   : > { %v1669_v47 = vpack.c.bf16 %v1668_v46, %v1668_v46 }
 0xe59   : > { %2570 = vmatmul.mubr.msk.bf16.vlgmr.msra.gmra.mxu1 %vm974_vm4, %v1669_v47 }
 0xe5a   : > { %2585 = vmatprep.mubr.msk.bf16.mxu1 %vm2811_vm1, %v2810_v18  ;;  %2582 = vmatpush3.bf16.msra.mxu1 %v2677_v45 }
 0xe5b   : > { %2583 = vmatprep.subr.bf16.mxu1 %v2810_v18 }
 0xf11   : > { %v1600_v53 = vpop.f32.mrf.mxu1 }
 0xf13   : > { %v2559_v54 = vpop.f32.mrf.mxu1 }
 0xf15   : > { %v1603_v28 = vpop.f32.mrf.mxu1 }
 0xf17   : > { %v2560_v56 = vpop.f32.mrf.mxu1 }
 0xf19   : > { %v1712_v57 = vpop.f32.mrf.mxu1 }
 0xf1a   : > { %1719 = vrot.lane.b32.xlu1 %v1712_v57, %s2818_s23 }
 0xf1b   : > { %v2571_v60 = vpop.f32.mrf.mxu1 }
 0xf1d   : > { %v1715_v61 = vpop.f32.mrf.mxu1 }
 0xf1f   : > { %v2572_v62 = vpop.f32.mrf.mxu1 }
 0xf8c   : > { %v1720_v63 = vpop.permute.xlu1 %1719 }
 0xf8d   : > { %v1722_v36 = vsel %vm919_vm2, %v1600_v53, %v1720_v63 }
 0xf8e   : > { %v1723_v0 = vpack.c.bf16 %v1722_v36, %v1722_v36 }
 0xf90   : > { %2578 = vmatmul.mubr.msk.bf16.vlgmr.msra.gmra.mxu0 %vm815_vm0, %v1723_v0 }
 0xf91   : > { %2597 = vmatprep.mubr.msk.bf16.mxu0 %vm2811_vm1, %v2810_v18  ;;  %2590 = vmatpush3.bf16.msra.mxu0 %v2679_v27 }
 0xf92   : > { %2591 = vmatprep.subr.bf16.mxu0 %v2810_v18 }
 0xf95   : > { %2592 = vmatpush3.bf16.msra.mxu0 %v2680_v58 }
 0xf96   : > { %2593 = vmatprep.subr.bf16.mxu0 %v2810_v18 }
 0xf99   : > { %2594 = vmatpush3.bf16.msra.mxu0 %v2681_v59 }
 0xf9a   : > { %2595 = vmatprep.subr.bf16.mxu0 %v2810_v18 }
 0xf9d   : > { %2596 = vmatpush3.bf16.msra.mxu0 %v2682_v29 }
0x1050   : > { %v1777_v3 = vpop.f32.mrf.mxu0 }
0x1051   : > { %v1778_v4 = vadd.f32 %v1777_v3, %v1727_v2  ;;  %v2064_v3 = vsel %vm2063_vm7, %v3048_v43, 0.0 }
0x1052   : > { %v2579_v5 = vpop.f32.mrf.mxu0 }
0x1053   : > { %v1783_v6 = vadd.f32 %v1778_v4, %v3165_v55  ;;  %v2678_v55 = vld [vmem:[%s3348_s9 + $0x10] sm:$0xff]  }
0x1054   : > { %v1780_v7 = vpop.f32.mrf.mxu0  ;;  %2584 = vmatpush3.bf16.msra.mxu1 %v2678_v55 }
0x1055   : > { %v1784_v8 = vsel %vm815_vm0, %v1783_v6, 0.0  ;;  %2601 = vmatprep.subr.mxu1 %v2810_v18 }
0x1056   : > { %1785 = vadd.xlane.f32.xlu1 %v1784_v8  ;;  %v2580_v9 = vpop.f32.mrf.mxu0 }
0x1057   : > { %v1988_v9 = vrot.slane %v3222_v1, %v1415_v50 }
0x10df   : > { %v1786_v10 = vpop.xlane.xlu1 %1785 }
0x10e0   : > { %v1787_v11 = vmul.f32 0.03125, %v1786_v10 }
0x10e2   : > { %v1788_v12 = vsub.f32 %v1783_v6, %v1787_v11  ;;  %v1983_v6 = vrot.slane %v3222_v1, %v1410_v49 }
0x10e4   : > { %v1789_v13 = vmul.f32 %v1788_v12, %v1788_v12 }
0x10e6   : > { %v1790_v14 = vsel %vm815_vm0, %v1789_v13, 0.0 }
0x10e7   : > { %1791 = vadd.xlane.f32.xlu0 %v1790_v14 }
0x1170   : > { %v1792_v15 = vpop.xlane.xlu0 %1791 }
0x1171   : > { %v1793_v16 = vmul.f32 0.03125, %v1792_v15 }
0x1173   : > { %v1794_v17 = vadd.f32 1e-12, %v1793_v16 }
0x1175   : > { %2709 = vrsqrt.f32 %v1794_v17 }
0x1182   : > { %v2710_v20 = vpop.eup %2709 }
0x1183   : > { %v1796_v21 = vmul.f32 %v2710_v20, %v1788_v12  ;;  %v2683_v12 = vld [vmem:[%s3343_s4 + $0x8] sm:$0xff]  }
0x1185   : > { %v1801_v23 = vmul.f32 %v1800_v19, %v1796_v21 }
0x1187   : > { %v1806_v25 = vadd.f32 %v1805_v22, %v1801_v23 }
0x1189   : > { %v1807_v26 = vpack.c.bf16 %v1806_v25, %v1806_v25 }
0x118b   : > { %2586 = vmatmul.mubr.msk.bf16.vlgmr.msra.gmra.mxu1 %vm815_vm0, %v1807_v26 }
0x118c   : > { %2603 = vmatprep.mubr.msk.f32.mxu1 %vm2811_vm1, %v2810_v18 }
0x124b   : > { %v1870_v48 = vpop.f32.mrf.mxu1 }
0x124c   : > { %v1871_v31 = vadd.f32 %v2400_v30, %v1870_v48 }
0x124d   : > { %v2587_v32 = vpop.f32.mrf.mxu1 }
0x124e   : > { %v1876_v33 = vmul.f32 %v1871_v31, %v1871_v31 }
0x124f   : > { %v1873_v34 = vpop.f32.mrf.mxu1 }
0x1250   : > { %v1877_v35 = vmul.f32 %v1876_v33, %v1871_v31 }
0x1251   : > { %v2588_v37 = vpop.f32.mrf.mxu1 }
0x1252   : > { %v1878_v38 = vmul.f32 0.044715, %v1877_v35 }
0x1254   : > { %v1879_v39 = vadd.f32 %v1878_v38, %v1871_v31 }
0x1256   : > { %v1880_v40 = vmul.f32 0.7978846, %v1879_v39 }
0x1258   : > { %2711 = vtanh.f32 %v1880_v40 }
0x1265   : > { %v2712_v41 = vpop.eup %2711 }
0x1266   : > { %v1882_v42 = vadd.f32 1.0, %v2712_v41 }
0x1268   : > { %v1883_v46 = vmul.f32 0.5, %v1882_v42 }
0x126a   : > { %v1884_v47 = vmul.f32 %v1883_v46, %v1871_v31 }
0x126c   : > { %v1885_v51 = vpack.c.bf16 %v1884_v47, %v1884_v47 }
0x126e   : > { %2598 = vmatmul.mubr.msk.bf16.vlgmr.msra.gmra.mxu0 %vm1350_vm6, %v1885_v51 }
0x132e   : > { %v1960_v53 = vpop.f32.mrf.mxu0 }
0x132f   : > { %v1961_v54 = vadd.f32 %v1960_v53, %v1898_v52 }
0x1330   : > { %v2599_v28 = vpop.f32.mrf.mxu0 }
0x1331   : > { %v1966_v56 = vadd.f32 %v1961_v54, %v1806_v25 }
0x1332   : > { %v1963_v57 = vpop.f32.mrf.mxu0 }
0x1333   : > { %v1967_v60 = vsel %vm815_vm0, %v1966_v56, 0.0 }
0x1334   : > { %1968 = vadd.xlane.f32.xlu0 %v1967_v60  ;;  %v2600_v61 = vpop.f32.mrf.mxu0 }
0x1338   : > { %2065 = vadd.xlane.f32.xlu0 %v2064_v3 }
0x13bd   : > { %v1969_v62 = vpop.xlane.xlu0 %1968 }
0x13be   : > { %v1970_v63 = vmul.f32 0.03125, %v1969_v62 }
0x13c0   : > { %v1971_v36 = vsub.f32 %v1966_v56, %v1970_v63 }
0x13c1   : > { %v2066_v49 = vpop.xlane.xlu0 %2065 }
0x13c2   : > { %v1972_v0 = vmul.f32 %v1971_v36, %v1971_v36  ;;  %v2067_v50 = vmax.f32 %v2066_v49, 1e-09 }
0x13c4   : > { %v1973_v2 = vsel %vm815_vm0, %v1972_v0, 0.0 }
0x13c5   : > { %1974 = vadd.xlane.f32.xlu1 %v1973_v2 }
0x144e   : > { %v1975_v24 = vpop.xlane.xlu1 %1974 }
0x144f   : > { %v1976_v4 = vmul.f32 0.03125, %v1975_v24 }
0x1451   : > { %v1977_v5 = vadd.f32 1e-12, %v1976_v4 }
0x1453   : > { %2713 = vrsqrt.f32 %v1977_v5 }
0x1454   : > { %2715 = vrcp.f32 %v2067_v50 }
0x1460   : > { %v2714_v7 = vpop.eup %2713 }
0x1461   : > { %v1979_v8 = vmul.f32 %v2714_v7, %v1971_v36 }
0x1463   : > { %v1984_v10 = vmul.f32 %v1983_v6, %v1979_v8 }
0x1465   : > { %v1989_v11 = vadd.f32 %v1988_v9, %v1984_v10 }
0x1467   : > { %2602 = vmatpush3.msra.mxu1 %v1989_v11 }
0x1468   : > { %2604 = vmatmul.mubr.msk.f32.vlgmr.msra.gmra.mxu1 %vm974_vm4, %v3048_v43  ;;  %2606 = vmatprep.subr.bf16.mxu1 %v2810_v18  ;;  %v2716_v43 = vpop.eup %2715 }
0x1469   : > { %2607 = vmatpush3.bf16.msra.mxu1 %v2683_v12  ;;  %2610 = vmatprep.mubr.msk.bf16.mxu1 %vm2811_vm1, %v2810_v18 }
0x146a   : > { %2608 = vmatprep.subr.bf16.mxu1 %v2810_v18 }
0x146d   : > { %2609 = vmatpush3.bf16.msra.mxu1 %v2684_v44 }
0x1528   : > { %v2059_v1 = vpop.f32.mrf.mxu1 }
0x1529   : > { %v2069_v13 = vmul.f32 %v2716_v43, %v2059_v1 }
0x152a   : > { %v2605_v14 = vpop.f32.mrf.mxu1 }
0x152b   : > { %v2070_v45 = vpack.c.bf16 %v2069_v13, %v2069_v13 }
0x152d   : > { %2611 = vmatmul.mubr.msk.bf16.vlgmr.msra.gmra.mxu1 %vm815_vm0, %v2070_v45 }
0x15ed   : > { %v2124_v18 = vpop.f32.mrf.mxu1 }
0x15ee   : > { %2131 = vst.msk [vmem:[%s2959_s0] sm:$0x1] %vm2130_vm8, %v2124_v18 }
0x15ef   : > { %v2612_v55 = vpop.f32.mrf.mxu1 }
0x15f0   : > { %2742 = shalt.err (!%p2739_p8)
}
0x15f1   : > { %s2743_s0 = scalar_lea.hbm %s3295_s20, 16  ;;  %s2747_s18 = scalar_lea.hbm %s3371_s19, 32 }
0x15f2   : > { %p2744_p9 = scmp.ne.s32.totalorder %s3295_s20, %s2743_s0  ;;  %p2748_p0 = scmp.lt.s32.totalorder %s3295_s20, %s3371_s19 }
0x15f3   : > { %p2749_p1 = scmp.lt.s32.totalorder %s2747_s18, %s2743_s0 }
0x15f4   : > { %p2745_p12 = pnand %p2744_p9, %p2931_p10 }
0x15f5   : > { %p2750_p2 = por %p2749_p1, %p2748_p0 }
0x15f6   : > { %p2746_p13 = pneg %p2745_p12 }
0x15f8   : > { %p2751_p3 = pnand %p2750_p2, %p2746_p13 }
0x15fa   : > { %2754 = shalt.err (!%p2751_p3)
}
0x15fb   : > { %2614 = dma.vmem_to_hbm [thread:$0]  (%p2931_p10), %s3297_s15, 16, %s3295_s20, %s2133_s21   ;;  %v2127_v15 = vpop.f32.mrf.mxu1 }
0x15fd   : > { %v2613_v16 = vpop.f32.mrf.mxu1 }
0x15fe PF: > { %s3373_s28 = sld [smem:[#allocation28_spill]] }
0x15ff   : > { %s3374_s29 = sld [smem:[#allocation26_spill]] }
0x1604   : > { %p2620_p4 = scmp.ge.s32.totalorder %s3373_s28, 2 }
0x1605   : > { %s2157_s25 = sand.u32 1, %s3374_s29  }
0x1606   : > { %p2617_p5 = pnand %p2620_p4, %p2935_p11  ;;  %s2158_s16 = scalar_lea.sflag [#allocation7], %s2157_s25 }
0x1608   : > { %p2618_p6 = pneg %p2617_p5 }
0x160a   : > { %2790 = dma.done.wait (%p2618_p6), %s2158_s16, 16  }
0x160b   : > { %2792 = vsyncadd (%p2618_p6), %s2158_s16, 4294967280  ;;  %s3376_s15 = sld [smem:[#allocation29_spill]]  ;;  %s3379_s30 = smov %s2799_s14 }
0x160c   : > { %s3377_s22 = sld [smem:[#allocation27_spill]] }
0x160d   : > { %s3378_s0 = sld [smem:[#allocation30_spill]] }
0x1611   : > { %p29_p10 = scmp.ge.s32.totalorder %s3376_s15, 4  }
0x1612   : > { %s3380_s14 = smov %s3377_s22 }
0x1613   :  { %31 = sbr.rel (!%p29_p10) target bundleno = 18 (0x12), region = 455 }
0x1618   :  { %2162 = vsyncpa [#allocation7], 1 }
0x1619   :  { %2164 = vsyncpa [#allocation7 + $0x1], 1 }
0x161a   :  { %2165 = vsyncmov [#allocation3] }
0x161d   :  { %s2166_s20 = vpop.sfrf %2165 }
0x161e   :  { %p2424_p11 = scmp.ne.s32.totalorder %s2166_s20, 0 }
0x1620   :  { %2170 = shalt.err (%p2424_p11)  }
0x1621   :  { %2172 = vsyncmov [#allocation3 + $0x1] }
0x1624   :  { %s2173_s21 = vpop.sfrf %2172 }
0x1625   :  { %p2425_p7 = scmp.ne.s32.totalorder %s2173_s21, 0 }
0x1627   :  { %2177 = shalt.err (%p2425_p7)  }
0x1628   :  { %2179 = vsyncmov [#allocation3 + $0x2] }
0x162b   :  { %s2180_s26 = vpop.sfrf %2179 }
0x162c   :  { %p2426_p8 = scmp.ne.s32.totalorder %s2180_s26, 0 }
0x162e   :  { %2184 = shalt.err (%p2426_p8)  }
0x162f   :  { %2186 = vsyncmov [#allocation3 + $0x3] }
0x1632   :  { %s2187_s17 = vpop.sfrf %2186 }
0x1633   :  { %p2427_p9 = scmp.ne.s32.totalorder %s2187_s17, 0 }
0x1635   :  { %2191 = shalt.err (%p2427_p9)  }
0x1636   :  { %2193 = vsyncmov [#allocation3 + $0x4] }
0x1639   :  { %s2194_s15 = vpop.sfrf %2193 }
0x163a   :  { %p2428_p12 = scmp.ne.s32.totalorder %s2194_s15, 0 }
0x163c   :  { %2198 = shalt.err (%p2428_p12)  }
0x163d   :  { %2200 = vsyncmov [#allocation3 + $0x5] }
0x1640   :  { %s2201_s1 = vpop.sfrf %2200 }
0x1641   :  { %p2429_p13 = scmp.ne.s32.totalorder %s2201_s1, 0 }
0x1643   :  { %2205 = shalt.err (%p2429_p13)  }
0x1644   :  { %2207 = vsyncmov [#allocation3 + $0x6] }
0x1647   :  { %s2208_s2 = vpop.sfrf %2207 }
0x1648   :  { %p2430_p0 = scmp.ne.s32.totalorder %s2208_s2, 0 }
0x164a   :  { %2212 = shalt.err (%p2430_p0)  }
0x164b   :  { %2214 = vsyncmov [#allocation3 + $0x7] }
0x164e   :  { %s2215_s3 = vpop.sfrf %2214 }
0x164f   :  { %p2431_p1 = scmp.ne.s32.totalorder %s2215_s3, 0 }
0x1651   :  { %2219 = shalt.err (%p2431_p1)  }

</bundles_post_ra>
